<compile_context>
chip_gen: v7x
topology: tpu7x:2x2x1
jax: 0.10.0
libtpu: 0.0.40
codegen_flags: <defaults>
</compile_context>

<pallas_src>
import math
import functools

import jax
import jax.numpy as jnp
from jax.experimental import pallas as pl
from jax.experimental.pallas import tpu as pltpu  # noqa: F401  (TPU backend)

HORIZON = 24


# ---------------------------------------------------------------------------
# in-kernel helpers
# ---------------------------------------------------------------------------
def _layernorm(x, gamma, beta, eps=1e-5):
    mean = jnp.mean(x, axis=-1, keepdims=True)
    var = jnp.mean((x - mean) ** 2, axis=-1, keepdims=True)
    return (x - mean) * jax.lax.rsqrt(var + eps) * gamma + beta


def _gelu_exact(x):
    # PyTorch activation='gelu' default is the exact erf formulation.
    return 0.5 * x * (1.0 + jax.lax.erf(x * (1.0 / math.sqrt(2.0))))


# ---------------------------------------------------------------------------
# fused forward kernel (single invocation, everything resident in VMEM)
# ---------------------------------------------------------------------------
def fused_forward_kernel(src_ref, pe_ref, emb_w_ref, emb_b_ref,
                         ln1g_ref, ln1b_ref, wqkv_ref, bqkv_ref, wo_ref, bo_ref,
                         ln2g_ref, ln2b_ref, w1_ref, b1_ref, w2_ref, b2_ref,
                         out_w_ref, out_b_ref, o_ref,
                         *, B, S, d_model, nhead, num_layers):
    D = d_model
    T = B * S
    dk = D // nhead
    inv_sqrt_dk = 1.0 / math.sqrt(dk)
    scale = math.sqrt(D)

    # ---- input embedding * sqrt(d_model) + positional encoding ----
    src = src_ref[...]                                              # (T, F)
    x = jnp.dot(src, emb_w_ref[...], preferred_element_type=jnp.float32)
    x = (x + emb_b_ref[0]) * scale + pe_ref[...]                    # (T, D)
    # dropout(0.1): identity (inference)

    # ---- pre-LN transformer encoder layers (weights stacked over layers) ----
    for li in range(num_layers):
        # --- self-attention block: x = x + Wo(MHA(LN1(x))) + bo ---
        h = _layernorm(x, ln1g_ref[li], ln1b_ref[li])               # (T, D)
        qkv = (jnp.dot(h, wqkv_ref[li], preferred_element_type=jnp.float32)
               + bqkv_ref[li])                                      # (T, 3D)
        q = qkv[:, 0 * D:1 * D].reshape(B, S, D)
        k = qkv[:, 1 * D:2 * D].reshape(B, S, D)
        v = qkv[:, 2 * D:3 * D].reshape(B, S, D)

        wo_l = wo_ref[li]                                           # (D, D)
        attn = jnp.zeros((T, D), jnp.float32)
        for hh in range(nhead):                                     # static unroll
            lo = hh * dk
            qh = q[:, :, lo:lo + dk]                                # (B, S, dk)
            kh = k[:, :, lo:lo + dk]
            vh = v[:, :, lo:lo + dk]
            s = jnp.einsum('bqd,bkd->bqk', qh, kh,
                           preferred_element_type=jnp.float32) * inv_sqrt_dk
            s = s - jnp.max(s, axis=-1, keepdims=True)
            p = jnp.exp(s)
            p = p * pl.reciprocal(jnp.sum(p, axis=-1, keepdims=True), approx=True)
            oh = jnp.einsum('bqk,bkd->bqd', p, vh,
                            preferred_element_type=jnp.float32)     # (B, S, dk)
            # fold this head's slice of the output projection (no lane concat)
            attn = attn + jnp.dot(oh.reshape(T, dk), wo_l[lo:lo + dk, :],
                                  preferred_element_type=jnp.float32)
        x = x + attn + bo_ref[li]

        # --- feed-forward block: x = x + W2(GELU(W1(LN2(x)) + b1)) + b2 ---
        h2 = _layernorm(x, ln2g_ref[li], ln2b_ref[li])
        ff = jnp.dot(h2, w1_ref[li], preferred_element_type=jnp.float32) + b1_ref[li]
        ff = _gelu_exact(ff)
        ff = jnp.dot(ff, w2_ref[li], preferred_element_type=jnp.float32) + b2_ref[li]
        x = x + ff

    # ---- head: last token of each sequence -> Linear(D, HORIZON) ----
    rows = [x[(b + 1) * S - 1:(b + 1) * S, :] for b in range(B)]    # B x (1, D)
    x_last = jnp.concatenate(rows, axis=0)                          # (B, D)
    o_ref[...] = (jnp.dot(x_last, out_w_ref[...],
                          preferred_element_type=jnp.float32) + out_b_ref[0])


# ---------------------------------------------------------------------------
# wrapper
# ---------------------------------------------------------------------------
def aqi_transformer_forward(src, params, *, d_model, nhead):
    B, S, F = src.shape
    num_layers = params["wqkv"].shape[0]

    pe = make_positional_encoding(S, d_model)
    pe_tiled = jnp.tile(pe, (B, 1))                                 # (B*S, D)
    src2 = src.reshape(B * S, F)

    kernel = functools.partial(fused_forward_kernel, B=B, S=S, d_model=d_model,
                               nhead=nhead, num_layers=num_layers)
    # single invocation (no grid): all inputs/outputs are full VMEM blocks
    return pl.pallas_call(
        kernel,
        out_shape=jax.ShapeDtypeStruct((B, HORIZON), jnp.float32),
    )(src2, pe_tiled, params["emb_w"], params["emb_b"],
      params["ln1_g"], params["ln1_b"], params["wqkv"], params["bqkv"],
      params["wo"], params["bo"], params["ln2_g"], params["ln2_b"],
      params["w1"], params["b1"], params["w2"], params["b2"],
      params["out_w"], params["out_b"])


# ---------------------------------------------------------------------------
# parameter init (deterministic, synthetic) + positional encoding
# ---------------------------------------------------------------------------
def _linear_params(key, fan_in, fan_out):
    kw, kb = jax.random.split(key)
    w = jax.random.normal(kw, (fan_in, fan_out), jnp.float32) * 0.05
    b = jax.random.normal(kb, (1, fan_out), jnp.float32) * 0.05
    return w, b


def init_params(key, num_features, d_model, num_layers, dim_feedforward):
    keys = jax.random.split(key, 2 + num_layers)
    params = {}
    params["emb_w"], params["emb_b"] = _linear_params(keys[0], num_features, d_model)
    params["out_w"], params["out_b"] = _linear_params(keys[1], d_model, HORIZON)

    def make_layer(k):
        lk = jax.random.split(k, 4)
        wqkv, bqkv = _linear_params(lk[0], d_model, 3 * d_model)
        wo, bo = _linear_params(lk[1], d_model, d_model)
        w1, b1 = _linear_params(lk[2], d_model, dim_feedforward)
        w2, b2 = _linear_params(lk[3], dim_feedforward, d_model)
        return dict(
            ln1_g=jnp.ones((1, d_model), jnp.float32),
            ln1_b=jnp.zeros((1, d_model), jnp.float32),
            ln2_g=jnp.ones((1, d_model), jnp.float32),
            ln2_b=jnp.zeros((1, d_model), jnp.float32),
            wqkv=wqkv, bqkv=bqkv, wo=wo, bo=bo,
            w1=w1, b1=b1, w2=w2, b2=b2,
        )

    layers = [make_layer(keys[2 + li]) for li in range(num_layers)]
    # stack all per-layer tensors on a leading layer axis for the fused kernel
    for name in layers[0]:
        params[name] = jnp.stack([l[name] for l in layers], axis=0)
    return params


def make_positional_encoding(seq_len, d_model):
    position = jnp.arange(seq_len, dtype=jnp.float32)[:, None]
    div_term = jnp.exp(jnp.arange(0, d_model, 2, dtype=jnp.float32)
                       * (-math.log(10000.0) / d_model))
    pe = jnp.zeros((seq_len, d_model), jnp.float32)
    pe = pe.at[:, 0::2].set(jnp.sin(position * div_term))
    pe = pe.at[:, 1::2].set(jnp.cos(position * div_term))   # d_model is even here
    return pe


if __name__ == "__main__":
    B, S, NUM_FEATURES = 2, 8, 4
    D_MODEL, NHEAD, NUM_LAYERS, DIM_FF = 32, 4, 2, 64

    key = jax.random.PRNGKey(0)
    k_in, k_params = jax.random.split(key)
    src = jax.random.normal(k_in, (B, S, NUM_FEATURES), jnp.float32)
    params = init_params(k_params, NUM_FEATURES, D_MODEL, NUM_LAYERS, DIM_FF)

    out = aqi_transformer_forward(src, params, d_model=D_MODEL, nhead=NHEAD)
    out = jax.block_until_ready(out)
    assert out.shape == (B, HORIZON), out.shape
    assert bool(jnp.all(jnp.isfinite(out)))
    print("KERNEL_OK")
</pallas_src>

<mosaic_0001>
module attributes {stable_mosaic.version = 11 : i64} {
  func.func @fused_forward_kernel(%arg0: memref<16x4xf32, #tpu.memory_space<vmem>>, %arg1: memref<16x32xf32, #tpu.memory_space<vmem>>, %arg2: memref<4x32xf32, #tpu.memory_space<vmem>>, %arg3: memref<1x32xf32, #tpu.memory_space<vmem>>, %arg4: memref<2x1x32xf32, #tpu.memory_space<vmem>>, %arg5: memref<2x1x32xf32, #tpu.memory_space<vmem>>, %arg6: memref<2x32x96xf32, #tpu.memory_space<vmem>>, %arg7: memref<2x1x96xf32, #tpu.memory_space<vmem>>, %arg8: memref<2x32x32xf32, #tpu.memory_space<vmem>>, %arg9: memref<2x1x32xf32, #tpu.memory_space<vmem>>, %arg10: memref<2x1x32xf32, #tpu.memory_space<vmem>>, %arg11: memref<2x1x32xf32, #tpu.memory_space<vmem>>, %arg12: memref<2x32x64xf32, #tpu.memory_space<vmem>>, %arg13: memref<2x1x64xf32, #tpu.memory_space<vmem>>, %arg14: memref<2x64x32xf32, #tpu.memory_space<vmem>>, %arg15: memref<2x1x32xf32, #tpu.memory_space<vmem>>, %arg16: memref<32x24xf32, #tpu.memory_space<vmem>>, %arg17: memref<1x24xf32, #tpu.memory_space<vmem>>, %arg18: memref<2x24xf32, #tpu.memory_space<vmem>>) attributes {dimension_semantics = [], scalar_prefetch = 0 : i64, scratch_operands = 0 : i64, tpu.core_type = #tpu.core_type<tc>} {
    %c0 = arith.constant 0 : index
    %c0_0 = arith.constant 0 : index
    %0 = vector.load %arg0[%c0, %c0_0] : memref<16x4xf32, #tpu.memory_space<vmem>>, vector<16x4xf32>
    %c0_1 = arith.constant 0 : index
    %c0_2 = arith.constant 0 : index
    %1 = vector.load %arg2[%c0_1, %c0_2] : memref<4x32xf32, #tpu.memory_space<vmem>>, vector<4x32xf32>
    %cst = arith.constant dense<0.000000e+00> : vector<16x32xf32>
    %2 = tpu.matmul %0, %1, %cst {dimension_numbers = #tpu.dot_dimension_numbers<[1], [0], [0], [1], [0, 0, 1, 1], [], []>} : vector<16x4xf32>, vector<4x32xf32>, vector<16x32xf32> -> vector<16x32xf32>
    %c0_3 = arith.constant 0 : index
    %c0_4 = arith.constant 0 : index
    %3 = vector.load %arg3[%c0_3, %c0_4] : memref<1x32xf32, #tpu.memory_space<vmem>>, vector<1x32xf32>
    %4 = vector.shape_cast %3 : vector<1x32xf32> to vector<32xf32>
    %5 = vector.shape_cast %4 : vector<32xf32> to vector<1x32xf32>
    %6 = vector.broadcast %5 : vector<1x32xf32> to vector<16x32xf32>
    %7 = arith.addf %2, %6 : vector<16x32xf32>
    %cst_5 = arith.constant 5.65685415 : f32
    %8 = vector.broadcast %cst_5 : f32 to vector<16x32xf32>
    %9 = arith.mulf %7, %8 : vector<16x32xf32>
    %c0_6 = arith.constant 0 : index
    %c0_7 = arith.constant 0 : index
    %10 = vector.load %arg1[%c0_6, %c0_7] : memref<16x32xf32, #tpu.memory_space<vmem>>, vector<16x32xf32>
    %11 = arith.addf %9, %10 : vector<16x32xf32>
    %c0_8 = arith.constant 0 : index
    %c0_9 = arith.constant 0 : index
    %c0_10 = arith.constant 0 : index
    %12 = vector.load %arg4[%c0_8, %c0_9, %c0_10] : memref<2x1x32xf32, #tpu.memory_space<vmem>>, vector<1x1x32xf32>
    %13 = vector.shape_cast %12 : vector<1x1x32xf32> to vector<1x32xf32>
    %c0_11 = arith.constant 0 : index
    %c0_12 = arith.constant 0 : index
    %c0_13 = arith.constant 0 : index
    %14 = vector.load %arg5[%c0_11, %c0_12, %c0_13] : memref<2x1x32xf32, #tpu.memory_space<vmem>>, vector<1x1x32xf32>
    %15 = vector.shape_cast %14 : vector<1x1x32xf32> to vector<1x32xf32>
    %cst_14 = arith.constant dense<0.000000e+00> : vector<16xf32>
    %16 = vector.multi_reduction <add>, %11, %cst_14 [1] : vector<16x32xf32> to vector<16xf32>
    %17 = vector.shape_cast %16 : vector<16xf32> to vector<16x1xf32>
    %cst_15 = arith.constant 3.200000e+01 : f32
    %18 = vector.broadcast %cst_15 : f32 to vector<16x1xf32>
    %19 = arith.divf %17, %18 : vector<16x1xf32>
    %20 = vector.broadcast %19 : vector<16x1xf32> to vector<16x32xf32>
    %21 = arith.subf %11, %20 : vector<16x32xf32>
    %22 = arith.mulf %21, %21 : vector<16x32xf32>
    %cst_16 = arith.constant dense<0.000000e+00> : vector<16xf32>
    %23 = vector.multi_reduction <add>, %22, %cst_16 [1] : vector<16x32xf32> to vector<16xf32>
    %24 = vector.shape_cast %23 : vector<16xf32> to vector<16x1xf32>
    %cst_17 = arith.constant 3.200000e+01 : f32
    %25 = vector.broadcast %cst_17 : f32 to vector<16x1xf32>
    %26 = arith.divf %24, %25 : vector<16x1xf32>
    %27 = vector.broadcast %19 : vector<16x1xf32> to vector<16x32xf32>
    %28 = arith.subf %11, %27 : vector<16x32xf32>
    %cst_18 = arith.constant 9.99999974E-6 : f32
    %29 = vector.broadcast %cst_18 : f32 to vector<16x1xf32>
    %30 = arith.addf %26, %29 : vector<16x1xf32>
    %31 = math.rsqrt %30 : vector<16x1xf32>
    %32 = vector.broadcast %31 : vector<16x1xf32> to vector<16x32xf32>
    %33 = arith.mulf %28, %32 : vector<16x32xf32>
    %34 = vector.broadcast %13 : vector<1x32xf32> to vector<16x32xf32>
    %35 = arith.mulf %33, %34 : vector<16x32xf32>
    %36 = vector.broadcast %15 : vector<1x32xf32> to vector<16x32xf32>
    %37 = arith.addf %35, %36 : vector<16x32xf32>
    %c0_19 = arith.constant 0 : index
    %c0_20 = arith.constant 0 : index
    %c0_21 = arith.constant 0 : index
    %38 = vector.load %arg6[%c0_19, %c0_20, %c0_21] : memref<2x32x96xf32, #tpu.memory_space<vmem>>, vector<1x32x96xf32>
    %39 = vector.shape_cast %38 : vector<1x32x96xf32> to vector<32x96xf32>
    %cst_22 = arith.constant dense<0.000000e+00> : vector<16x96xf32>
    %40 = tpu.matmul %37, %39, %cst_22 {dimension_numbers = #tpu.dot_dimension_numbers<[1], [0], [0], [1], [0, 0, 1, 1], [], []>} : vector<16x32xf32>, vector<32x96xf32>, vector<16x96xf32> -> vector<16x96xf32>
    %c0_23 = arith.constant 0 : index
    %c0_24 = arith.constant 0 : index
    %c0_25 = arith.constant 0 : index
    %41 = vector.load %arg7[%c0_23, %c0_24, %c0_25] : memref<2x1x96xf32, #tpu.memory_space<vmem>>, vector<1x1x96xf32>
    %42 = vector.shape_cast %41 : vector<1x1x96xf32> to vector<1x96xf32>
    %43 = vector.broadcast %42 : vector<1x96xf32> to vector<16x96xf32>
    %44 = arith.addf %40, %43 : vector<16x96xf32>
    %45 = vector.extract_strided_slice %44 {offsets = [0, 0], sizes = [16, 32], strides = [1, 1]} : vector<16x96xf32> to vector<16x32xf32>
    %46 = vector.shape_cast %45 : vector<16x32xf32> to vector<2x8x32xf32>
    %47 = vector.extract_strided_slice %44 {offsets = [0, 32], sizes = [16, 32], strides = [1, 1]} : vector<16x96xf32> to vector<16x32xf32>
    %48 = vector.shape_cast %47 : vector<16x32xf32> to vector<2x8x32xf32>
    %49 = vector.extract_strided_slice %44 {offsets = [0, 64], sizes = [16, 32], strides = [1, 1]} : vector<16x96xf32> to vector<16x32xf32>
    %50 = vector.shape_cast %49 : vector<16x32xf32> to vector<2x8x32xf32>
    %c0_26 = arith.constant 0 : index
    %c0_27 = arith.constant 0 : index
    %c0_28 = arith.constant 0 : index
    %51 = vector.load %arg8[%c0_26, %c0_27, %c0_28] : memref<2x32x32xf32, #tpu.memory_space<vmem>>, vector<1x32x32xf32>
    %52 = vector.shape_cast %51 : vector<1x32x32xf32> to vector<32x32xf32>
    %cst_29 = arith.constant 0.000000e+00 : f32
    %53 = vector.broadcast %cst_29 : f32 to vector<16x32xf32>
    %54 = vector.extract_strided_slice %46 {offsets = [0, 0, 0], sizes = [2, 8, 8], strides = [1, 1, 1]} : vector<2x8x32xf32> to vector<2x8x8xf32>
    %55 = vector.extract_strided_slice %48 {offsets = [0, 0, 0], sizes = [2, 8, 8], strides = [1, 1, 1]} : vector<2x8x32xf32> to vector<2x8x8xf32>
    %56 = vector.extract_strided_slice %50 {offsets = [0, 0, 0], sizes = [2, 8, 8], strides = [1, 1, 1]} : vector<2x8x32xf32> to vector<2x8x8xf32>
    "tpu.trace_start"() <{level = 10 : i32, message = "bqd,bkd->bqk"}> : () -> ()
    %cst_30 = arith.constant dense<0.000000e+00> : vector<2x8x8xf32>
    %57 = tpu.matmul %54, %55, %cst_30 {dimension_numbers = #tpu.dot_dimension_numbers<[2], [2], [1], [1], [0, 0, 0, 1, 1, 1], [0], [0]>} : vector<2x8x8xf32>, vector<2x8x8xf32>, vector<2x8x8xf32> -> vector<2x8x8xf32>
    "tpu.trace_stop"() : () -> ()
    %cst_31 = arith.constant 0.353553385 : f32
    %58 = vector.broadcast %cst_31 : f32 to vector<2x8x8xf32>
    %59 = arith.mulf %57, %58 : vector<2x8x8xf32>
    %cst_32 = arith.constant dense<0xFF800000> : vector<2x8xf32>
    %60 = vector.multi_reduction <maximumf>, %59, %cst_32 [2] : vector<2x8x8xf32> to vector<2x8xf32>
    %61 = vector.shape_cast %60 : vector<2x8xf32> to vector<2x8x1xf32>
    %62 = vector.broadcast %61 : vector<2x8x1xf32> to vector<2x8x8xf32>
    %63 = arith.subf %59, %62 : vector<2x8x8xf32>
    %64 = math.exp %63 : vector<2x8x8xf32>
    %cst_33 = arith.constant dense<0.000000e+00> : vector<2x8xf32>
    %65 = vector.multi_reduction <add>, %64, %cst_33 [2] : vector<2x8x8xf32> to vector<2x8xf32>
    %66 = vector.shape_cast %65 : vector<2x8xf32> to vector<2x8x1xf32>
    %67 = tpu.reciprocal %66 {approx = true} : vector<2x8x1xf32> -> vector<2x8x1xf32>
    %68 = vector.broadcast %67 : vector<2x8x1xf32> to vector<2x8x8xf32>
    %69 = arith.mulf %64, %68 : vector<2x8x8xf32>
    "tpu.trace_start"() <{level = 10 : i32, message = "bqk,bkd->bqd"}> : () -> ()
    %cst_34 = arith.constant dense<0.000000e+00> : vector<2x8x8xf32>
    %70 = tpu.matmul %69, %56, %cst_34 {dimension_numbers = #tpu.dot_dimension_numbers<[2], [1], [1], [2], [0, 0, 0, 1, 1, 2], [0], [0]>} : vector<2x8x8xf32>, vector<2x8x8xf32>, vector<2x8x8xf32> -> vector<2x8x8xf32>
    "tpu.trace_stop"() : () -> ()
    %71 = vector.shape_cast %70 : vector<2x8x8xf32> to vector<16x8xf32>
    %72 = vector.extract_strided_slice %52 {offsets = [0, 0], sizes = [8, 32], strides = [1, 1]} : vector<32x32xf32> to vector<8x32xf32>
    %cst_35 = arith.constant dense<0.000000e+00> : vector<16x32xf32>
    %73 = tpu.matmul %71, %72, %cst_35 {dimension_numbers = #tpu.dot_dimension_numbers<[1], [0], [0], [1], [0, 0, 1, 1], [], []>} : vector<16x8xf32>, vector<8x32xf32>, vector<16x32xf32> -> vector<16x32xf32>
    %74 = arith.addf %53, %73 : vector<16x32xf32>
    %75 = vector.extract_strided_slice %46 {offsets = [0, 0, 8], sizes = [2, 8, 8], strides = [1, 1, 1]} : vector<2x8x32xf32> to vector<2x8x8xf32>
    %76 = vector.extract_strided_slice %48 {offsets = [0, 0, 8], sizes = [2, 8, 8], strides = [1, 1, 1]} : vector<2x8x32xf32> to vector<2x8x8xf32>
    %77 = vector.extract_strided_slice %50 {offsets = [0, 0, 8], sizes = [2, 8, 8], strides = [1, 1, 1]} : vector<2x8x32xf32> to vector<2x8x8xf32>
    "tpu.trace_start"() <{level = 10 : i32, message = "bqd,bkd->bqk"}> : () -> ()
    %cst_36 = arith.constant dense<0.000000e+00> : vector<2x8x8xf32>
    %78 = tpu.matmul %75, %76, %cst_36 {dimension_numbers = #tpu.dot_dimension_numbers<[2], [2], [1], [1], [0, 0, 0, 1, 1, 1], [0], [0]>} : vector<2x8x8xf32>, vector<2x8x8xf32>, vector<2x8x8xf32> -> vector<2x8x8xf32>
    "tpu.trace_stop"() : () -> ()
    %cst_37 = arith.constant 0.353553385 : f32
    %79 = vector.broadcast %cst_37 : f32 to vector<2x8x8xf32>
    %80 = arith.mulf %78, %79 : vector<2x8x8xf32>
    %cst_38 = arith.constant dense<0xFF800000> : vector<2x8xf32>
    %81 = vector.multi_reduction <maximumf>, %80, %cst_38 [2] : vector<2x8x8xf32> to vector<2x8xf32>
    %82 = vector.shape_cast %81 : vector<2x8xf32> to vector<2x8x1xf32>
    %83 = vector.broadcast %82 : vector<2x8x1xf32> to vector<2x8x8xf32>
    %84 = arith.subf %80, %83 : vector<2x8x8xf32>
    %85 = math.exp %84 : vector<2x8x8xf32>
    %cst_39 = arith.constant dense<0.000000e+00> : vector<2x8xf32>
    %86 = vector.multi_reduction <add>, %85, %cst_39 [2] : vector<2x8x8xf32> to vector<2x8xf32>
    %87 = vector.shape_cast %86 : vector<2x8xf32> to vector<2x8x1xf32>
    %88 = tpu.reciprocal %87 {approx = true} : vector<2x8x1xf32> -> vector<2x8x1xf32>
    %89 = vector.broadcast %88 : vector<2x8x1xf32> to vector<2x8x8xf32>
    %90 = arith.mulf %85, %89 : vector<2x8x8xf32>
    "tpu.trace_start"() <{level = 10 : i32, message = "bqk,bkd->bqd"}> : () -> ()
    %cst_40 = arith.constant dense<0.000000e+00> : vector<2x8x8xf32>
    %91 = tpu.matmul %90, %77, %cst_40 {dimension_numbers = #tpu.dot_dimension_numbers<[2], [1], [1], [2], [0, 0, 0, 1, 1, 2], [0], [0]>} : vector<2x8x8xf32>, vector<2x8x8xf32>, vector<2x8x8xf32> -> vector<2x8x8xf32>
    "tpu.trace_stop"() : () -> ()
    %92 = vector.shape_cast %91 : vector<2x8x8xf32> to vector<16x8xf32>
    %93 = vector.extract_strided_slice %52 {offsets = [8, 0], sizes = [8, 32], strides = [1, 1]} : vector<32x32xf32> to vector<8x32xf32>
    %cst_41 = arith.constant dense<0.000000e+00> : vector<16x32xf32>
    %94 = tpu.matmul %92, %93, %cst_41 {dimension_numbers = #tpu.dot_dimension_numbers<[1], [0], [0], [1], [0, 0, 1, 1], [], []>} : vector<16x8xf32>, vector<8x32xf32>, vector<16x32xf32> -> vector<16x32xf32>
    %95 = arith.addf %74, %94 : vector<16x32xf32>
    %96 = vector.extract_strided_slice %46 {offsets = [0, 0, 16], sizes = [2, 8, 8], strides = [1, 1, 1]} : vector<2x8x32xf32> to vector<2x8x8xf32>
    %97 = vector.extract_strided_slice %48 {offsets = [0, 0, 16], sizes = [2, 8, 8], strides = [1, 1, 1]} : vector<2x8x32xf32> to vector<2x8x8xf32>
    %98 = vector.extract_strided_slice %50 {offsets = [0, 0, 16], sizes = [2, 8, 8], strides = [1, 1, 1]} : vector<2x8x32xf32> to vector<2x8x8xf32>
    "tpu.trace_start"() <{level = 10 : i32, message = "bqd,bkd->bqk"}> : () -> ()
    %cst_42 = arith.constant dense<0.000000e+00> : vector<2x8x8xf32>
    %99 = tpu.matmul %96, %97, %cst_42 {dimension_numbers = #tpu.dot_dimension_numbers<[2], [2], [1], [1], [0, 0, 0, 1, 1, 1], [0], [0]>} : vector<2x8x8xf32>, vector<2x8x8xf32>, vector<2x8x8xf32> -> vector<2x8x8xf32>
    "tpu.trace_stop"() : () -> ()
    %cst_43 = arith.constant 0.353553385 : f32
    %100 = vector.broadcast %cst_43 : f32 to vector<2x8x8xf32>
    %101 = arith.mulf %99, %100 : vector<2x8x8xf32>
    %cst_44 = arith.constant dense<0xFF800000> : vector<2x8xf32>
    %102 = vector.multi_reduction <maximumf>, %101, %cst_44 [2] : vector<2x8x8xf32> to vector<2x8xf32>
    %103 = vector.shape_cast %102 : vector<2x8xf32> to vector<2x8x1xf32>
    %104 = vector.broadcast %103 : vector<2x8x1xf32> to vector<2x8x8xf32>
    %105 = arith.subf %101, %104 : vector<2x8x8xf32>
    %106 = math.exp %105 : vector<2x8x8xf32>
    %cst_45 = arith.constant dense<0.000000e+00> : vector<2x8xf32>
    %107 = vector.multi_reduction <add>, %106, %cst_45 [2] : vector<2x8x8xf32> to vector<2x8xf32>
    %108 = vector.shape_cast %107 : vector<2x8xf32> to vector<2x8x1xf32>
    %109 = tpu.reciprocal %108 {approx = true} : vector<2x8x1xf32> -> vector<2x8x1xf32>
    %110 = vector.broadcast %109 : vector<2x8x1xf32> to vector<2x8x8xf32>
    %111 = arith.mulf %106, %110 : vector<2x8x8xf32>
    "tpu.trace_start"() <{level = 10 : i32, message = "bqk,bkd->bqd"}> : () -> ()
    %cst_46 = arith.constant dense<0.000000e+00> : vector<2x8x8xf32>
    %112 = tpu.matmul %111, %98, %cst_46 {dimension_numbers = #tpu.dot_dimension_numbers<[2], [1], [1], [2], [0, 0, 0, 1, 1, 2], [0], [0]>} : vector<2x8x8xf32>, vector<2x8x8xf32>, vector<2x8x8xf32> -> vector<2x8x8xf32>
    "tpu.trace_stop"() : () -> ()
    %113 = vector.shape_cast %112 : vector<2x8x8xf32> to vector<16x8xf32>
    %114 = vector.extract_strided_slice %52 {offsets = [16, 0], sizes = [8, 32], strides = [1, 1]} : vector<32x32xf32> to vector<8x32xf32>
    %cst_47 = arith.constant dense<0.000000e+00> : vector<16x32xf32>
    %115 = tpu.matmul %113, %114, %cst_47 {dimension_numbers = #tpu.dot_dimension_numbers<[1], [0], [0], [1], [0, 0, 1, 1], [], []>} : vector<16x8xf32>, vector<8x32xf32>, vector<16x32xf32> -> vector<16x32xf32>
    %116 = arith.addf %95, %115 : vector<16x32xf32>
    %117 = vector.extract_strided_slice %46 {offsets = [0, 0, 24], sizes = [2, 8, 8], strides = [1, 1, 1]} : vector<2x8x32xf32> to vector<2x8x8xf32>
    %118 = vector.extract_strided_slice %48 {offsets = [0, 0, 24], sizes = [2, 8, 8], strides = [1, 1, 1]} : vector<2x8x32xf32> to vector<2x8x8xf32>
    %119 = vector.extract_strided_slice %50 {offsets = [0, 0, 24], sizes = [2, 8, 8], strides = [1, 1, 1]} : vector<2x8x32xf32> to vector<2x8x8xf32>
    "tpu.trace_start"() <{level = 10 : i32, message = "bqd,bkd->bqk"}> : () -> ()
    %cst_48 = arith.constant dense<0.000000e+00> : vector<2x8x8xf32>
    %120 = tpu.matmul %117, %118, %cst_48 {dimension_numbers = #tpu.dot_dimension_numbers<[2], [2], [1], [1], [0, 0, 0, 1, 1, 1], [0], [0]>} : vector<2x8x8xf32>, vector<2x8x8xf32>, vector<2x8x8xf32> -> vector<2x8x8xf32>
    "tpu.trace_stop"() : () -> ()
    %cst_49 = arith.constant 0.353553385 : f32
    %121 = vector.broadcast %cst_49 : f32 to vector<2x8x8xf32>
    %122 = arith.mulf %120, %121 : vector<2x8x8xf32>
    %cst_50 = arith.constant dense<0xFF800000> : vector<2x8xf32>
    %123 = vector.multi_reduction <maximumf>, %122, %cst_50 [2] : vector<2x8x8xf32> to vector<2x8xf32>
    %124 = vector.shape_cast %123 : vector<2x8xf32> to vector<2x8x1xf32>
    %125 = vector.broadcast %124 : vector<2x8x1xf32> to vector<2x8x8xf32>
    %126 = arith.subf %122, %125 : vector<2x8x8xf32>
    %127 = math.exp %126 : vector<2x8x8xf32>
    %cst_51 = arith.constant dense<0.000000e+00> : vector<2x8xf32>
    %128 = vector.multi_reduction <add>, %127, %cst_51 [2] : vector<2x8x8xf32> to vector<2x8xf32>
    %129 = vector.shape_cast %128 : vector<2x8xf32> to vector<2x8x1xf32>
    %130 = tpu.reciprocal %129 {approx = true} : vector<2x8x1xf32> -> vector<2x8x1xf32>
    %131 = vector.broadcast %130 : vector<2x8x1xf32> to vector<2x8x8xf32>
    %132 = arith.mulf %127, %131 : vector<2x8x8xf32>
    "tpu.trace_start"() <{level = 10 : i32, message = "bqk,bkd->bqd"}> : () -> ()
    %cst_52 = arith.constant dense<0.000000e+00> : vector<2x8x8xf32>
    %133 = tpu.matmul %132, %119, %cst_52 {dimension_numbers = #tpu.dot_dimension_numbers<[2], [1], [1], [2], [0, 0, 0, 1, 1, 2], [0], [0]>} : vector<2x8x8xf32>, vector<2x8x8xf32>, vector<2x8x8xf32> -> vector<2x8x8xf32>
    "tpu.trace_stop"() : () -> ()
    %134 = vector.shape_cast %133 : vector<2x8x8xf32> to vector<16x8xf32>
    %135 = vector.extract_strided_slice %52 {offsets = [24, 0], sizes = [8, 32], strides = [1, 1]} : vector<32x32xf32> to vector<8x32xf32>
    %cst_53 = arith.constant dense<0.000000e+00> : vector<16x32xf32>
    %136 = tpu.matmul %134, %135, %cst_53 {dimension_numbers = #tpu.dot_dimension_numbers<[1], [0], [0], [1], [0, 0, 1, 1], [], []>} : vector<16x8xf32>, vector<8x32xf32>, vector<16x32xf32> -> vector<16x32xf32>
    %137 = arith.addf %116, %136 : vector<16x32xf32>
    %138 = arith.addf %11, %137 : vector<16x32xf32>
    %c0_54 = arith.constant 0 : index
    %c0_55 = arith.constant 0 : index
    %c0_56 = arith.constant 0 : index
    %139 = vector.load %arg9[%c0_54, %c0_55, %c0_56] : memref<2x1x32xf32, #tpu.memory_space<vmem>>, vector<1x1x32xf32>
    %140 = vector.shape_cast %139 : vector<1x1x32xf32> to vector<1x32xf32>
    %141 = vector.broadcast %140 : vector<1x32xf32> to vector<16x32xf32>
    %142 = arith.addf %138, %141 : vector<16x32xf32>
    %c0_57 = arith.constant 0 : index
    %c0_58 = arith.constant 0 : index
    %c0_59 = arith.constant 0 : index
    %143 = vector.load %arg10[%c0_57, %c0_58, %c0_59] : memref<2x1x32xf32, #tpu.memory_space<vmem>>, vector<1x1x32xf32>
    %144 = vector.shape_cast %143 : vector<1x1x32xf32> to vector<1x32xf32>
    %c0_60 = arith.constant 0 : index
    %c0_61 = arith.constant 0 : index
    %c0_62 = arith.constant 0 : index
    %145 = vector.load %arg11[%c0_60, %c0_61, %c0_62] : memref<2x1x32xf32, #tpu.memory_space<vmem>>, vector<1x1x32xf32>
    %146 = vector.shape_cast %145 : vector<1x1x32xf32> to vector<1x32xf32>
    %cst_63 = arith.constant dense<0.000000e+00> : vector<16xf32>
    %147 = vector.multi_reduction <add>, %142, %cst_63 [1] : vector<16x32xf32> to vector<16xf32>
    %148 = vector.shape_cast %147 : vector<16xf32> to vector<16x1xf32>
    %cst_64 = arith.constant 3.200000e+01 : f32
    %149 = vector.broadcast %cst_64 : f32 to vector<16x1xf32>
    %150 = arith.divf %148, %149 : vector<16x1xf32>
    %151 = vector.broadcast %150 : vector<16x1xf32> to vector<16x32xf32>
    %152 = arith.subf %142, %151 : vector<16x32xf32>
    %153 = arith.mulf %152, %152 : vector<16x32xf32>
    %cst_65 = arith.constant dense<0.000000e+00> : vector<16xf32>
    %154 = vector.multi_reduction <add>, %153, %cst_65 [1] : vector<16x32xf32> to vector<16xf32>
    %155 = vector.shape_cast %154 : vector<16xf32> to vector<16x1xf32>
    %cst_66 = arith.constant 3.200000e+01 : f32
    %156 = vector.broadcast %cst_66 : f32 to vector<16x1xf32>
    %157 = arith.divf %155, %156 : vector<16x1xf32>
    %158 = vector.broadcast %150 : vector<16x1xf32> to vector<16x32xf32>
    %159 = arith.subf %142, %158 : vector<16x32xf32>
    %cst_67 = arith.constant 9.99999974E-6 : f32
    %160 = vector.broadcast %cst_67 : f32 to vector<16x1xf32>
    %161 = arith.addf %157, %160 : vector<16x1xf32>
    %162 = math.rsqrt %161 : vector<16x1xf32>
    %163 = vector.broadcast %162 : vector<16x1xf32> to vector<16x32xf32>
    %164 = arith.mulf %159, %163 : vector<16x32xf32>
    %165 = vector.broadcast %144 : vector<1x32xf32> to vector<16x32xf32>
    %166 = arith.mulf %164, %165 : vector<16x32xf32>
    %167 = vector.broadcast %146 : vector<1x32xf32> to vector<16x32xf32>
    %168 = arith.addf %166, %167 : vector<16x32xf32>
    %c0_68 = arith.constant 0 : index
    %c0_69 = arith.constant 0 : index
    %c0_70 = arith.constant 0 : index
    %169 = vector.load %arg12[%c0_68, %c0_69, %c0_70] : memref<2x32x64xf32, #tpu.memory_space<vmem>>, vector<1x32x64xf32>
    %170 = vector.shape_cast %169 : vector<1x32x64xf32> to vector<32x64xf32>
    %cst_71 = arith.constant dense<0.000000e+00> : vector<16x64xf32>
    %171 = tpu.matmul %168, %170, %cst_71 {dimension_numbers = #tpu.dot_dimension_numbers<[1], [0], [0], [1], [0, 0, 1, 1], [], []>} : vector<16x32xf32>, vector<32x64xf32>, vector<16x64xf32> -> vector<16x64xf32>
    %c0_72 = arith.constant 0 : index
    %c0_73 = arith.constant 0 : index
    %c0_74 = arith.constant 0 : index
    %172 = vector.load %arg13[%c0_72, %c0_73, %c0_74] : memref<2x1x64xf32, #tpu.memory_space<vmem>>, vector<1x1x64xf32>
    %173 = vector.shape_cast %172 : vector<1x1x64xf32> to vector<1x64xf32>
    %174 = vector.broadcast %173 : vector<1x64xf32> to vector<16x64xf32>
    %175 = arith.addf %171, %174 : vector<16x64xf32>
    %cst_75 = arith.constant 5.000000e-01 : f32
    %176 = vector.broadcast %cst_75 : f32 to vector<16x64xf32>
    %177 = arith.mulf %176, %175 : vector<16x64xf32>
    %cst_76 = arith.constant 0.707106769 : f32
    %178 = vector.broadcast %cst_76 : f32 to vector<16x64xf32>
    %179 = arith.mulf %175, %178 : vector<16x64xf32>
    %180 = math.erf %179 : vector<16x64xf32>
    %cst_77 = arith.constant 1.000000e+00 : f32
    %181 = vector.broadcast %cst_77 : f32 to vector<16x64xf32>
    %182 = arith.addf %181, %180 : vector<16x64xf32>
    %183 = arith.mulf %177, %182 : vector<16x64xf32>
    %c0_78 = arith.constant 0 : index
    %c0_79 = arith.constant 0 : index
    %c0_80 = arith.constant 0 : index
    %184 = vector.load %arg14[%c0_78, %c0_79, %c0_80] : memref<2x64x32xf32, #tpu.memory_space<vmem>>, vector<1x64x32xf32>
    %185 = vector.shape_cast %184 : vector<1x64x32xf32> to vector<64x32xf32>
    %cst_81 = arith.constant dense<0.000000e+00> : vector<16x32xf32>
    %186 = tpu.matmul %183, %185, %cst_81 {dimension_numbers = #tpu.dot_dimension_numbers<[1], [0], [0], [1], [0, 0, 1, 1], [], []>} : vector<16x64xf32>, vector<64x32xf32>, vector<16x32xf32> -> vector<16x32xf32>
    %c0_82 = arith.constant 0 : index
    %c0_83 = arith.constant 0 : index
    %c0_84 = arith.constant 0 : index
    %187 = vector.load %arg15[%c0_82, %c0_83, %c0_84] : memref<2x1x32xf32, #tpu.memory_space<vmem>>, vector<1x1x32xf32>
    %188 = vector.shape_cast %187 : vector<1x1x32xf32> to vector<1x32xf32>
    %189 = vector.broadcast %188 : vector<1x32xf32> to vector<16x32xf32>
    %190 = arith.addf %186, %189 : vector<16x32xf32>
    %191 = arith.addf %142, %190 : vector<16x32xf32>
    %c1 = arith.constant 1 : index
    %c0_85 = arith.constant 0 : index
    %c0_86 = arith.constant 0 : index
    %192 = vector.load %arg4[%c1, %c0_85, %c0_86] : memref<2x1x32xf32, #tpu.memory_space<vmem>>, vector<1x1x32xf32>
    %193 = vector.shape_cast %192 : vector<1x1x32xf32> to vector<1x32xf32>
    %c1_87 = arith.constant 1 : index
    %c0_88 = arith.constant 0 : index
    %c0_89 = arith.constant 0 : index
    %194 = vector.load %arg5[%c1_87, %c0_88, %c0_89] : memref<2x1x32xf32, #tpu.memory_space<vmem>>, vector<1x1x32xf32>
    %195 = vector.shape_cast %194 : vector<1x1x32xf32> to vector<1x32xf32>
    %cst_90 = arith.constant dense<0.000000e+00> : vector<16xf32>
    %196 = vector.multi_reduction <add>, %191, %cst_90 [1] : vector<16x32xf32> to vector<16xf32>
    %197 = vector.shape_cast %196 : vector<16xf32> to vector<16x1xf32>
    %cst_91 = arith.constant 3.200000e+01 : f32
    %198 = vector.broadcast %cst_91 : f32 to vector<16x1xf32>
    %199 = arith.divf %197, %198 : vector<16x1xf32>
    %200 = vector.broadcast %199 : vector<16x1xf32> to vector<16x32xf32>
    %201 = arith.subf %191, %200 : vector<16x32xf32>
    %202 = arith.mulf %201, %201 : vector<16x32xf32>
    %cst_92 = arith.constant dense<0.000000e+00> : vector<16xf32>
    %203 = vector.multi_reduction <add>, %202, %cst_92 [1] : vector<16x32xf32> to vector<16xf32>
    %204 = vector.shape_cast %203 : vector<16xf32> to vector<16x1xf32>
    %cst_93 = arith.constant 3.200000e+01 : f32
    %205 = vector.broadcast %cst_93 : f32 to vector<16x1xf32>
    %206 = arith.divf %204, %205 : vector<16x1xf32>
    %207 = vector.broadcast %199 : vector<16x1xf32> to vector<16x32xf32>
    %208 = arith.subf %191, %207 : vector<16x32xf32>
    %cst_94 = arith.constant 9.99999974E-6 : f32
    %209 = vector.broadcast %cst_94 : f32 to vector<16x1xf32>
    %210 = arith.addf %206, %209 : vector<16x1xf32>
    %211 = math.rsqrt %210 : vector<16x1xf32>
    %212 = vector.broadcast %211 : vector<16x1xf32> to vector<16x32xf32>
    %213 = arith.mulf %208, %212 : vector<16x32xf32>
    %214 = vector.broadcast %193 : vector<1x32xf32> to vector<16x32xf32>
    %215 = arith.mulf %213, %214 : vector<16x32xf32>
    %216 = vector.broadcast %195 : vector<1x32xf32> to vector<16x32xf32>
    %217 = arith.addf %215, %216 : vector<16x32xf32>
    %c1_95 = arith.constant 1 : index
    %c0_96 = arith.constant 0 : index
    %c0_97 = arith.constant 0 : index
    %218 = vector.load %arg6[%c1_95, %c0_96, %c0_97] : memref<2x32x96xf32, #tpu.memory_space<vmem>>, vector<1x32x96xf32>
    %219 = vector.shape_cast %218 : vector<1x32x96xf32> to vector<32x96xf32>
    %cst_98 = arith.constant dense<0.000000e+00> : vector<16x96xf32>
    %220 = tpu.matmul %217, %219, %cst_98 {dimension_numbers = #tpu.dot_dimension_numbers<[1], [0], [0], [1], [0, 0, 1, 1], [], []>} : vector<16x32xf32>, vector<32x96xf32>, vector<16x96xf32> -> vector<16x96xf32>
    %c1_99 = arith.constant 1 : index
    %c0_100 = arith.constant 0 : index
    %c0_101 = arith.constant 0 : index
    %221 = vector.load %arg7[%c1_99, %c0_100, %c0_101] : memref<2x1x96xf32, #tpu.memory_space<vmem>>, vector<1x1x96xf32>
    %222 = vector.shape_cast %221 : vector<1x1x96xf32> to vector<1x96xf32>
    %223 = vector.broadcast %222 : vector<1x96xf32> to vector<16x96xf32>
    %224 = arith.addf %220, %223 : vector<16x96xf32>
    %225 = vector.extract_strided_slice %224 {offsets = [0, 0], sizes = [16, 32], strides = [1, 1]} : vector<16x96xf32> to vector<16x32xf32>
    %226 = vector.shape_cast %225 : vector<16x32xf32> to vector<2x8x32xf32>
    %227 = vector.extract_strided_slice %224 {offsets = [0, 32], sizes = [16, 32], strides = [1, 1]} : vector<16x96xf32> to vector<16x32xf32>
    %228 = vector.shape_cast %227 : vector<16x32xf32> to vector<2x8x32xf32>
    %229 = vector.extract_strided_slice %224 {offsets = [0, 64], sizes = [16, 32], strides = [1, 1]} : vector<16x96xf32> to vector<16x32xf32>
    %230 = vector.shape_cast %229 : vector<16x32xf32> to vector<2x8x32xf32>
    %c1_102 = arith.constant 1 : index
    %c0_103 = arith.constant 0 : index
    %c0_104 = arith.constant 0 : index
    %231 = vector.load %arg8[%c1_102, %c0_103, %c0_104] : memref<2x32x32xf32, #tpu.memory_space<vmem>>, vector<1x32x32xf32>
    %232 = vector.shape_cast %231 : vector<1x32x32xf32> to vector<32x32xf32>
    %cst_105 = arith.constant 0.000000e+00 : f32
    %233 = vector.broadcast %cst_105 : f32 to vector<16x32xf32>
    %234 = vector.extract_strided_slice %226 {offsets = [0, 0, 0], sizes = [2, 8, 8], strides = [1, 1, 1]} : vector<2x8x32xf32> to vector<2x8x8xf32>
    %235 = vector.extract_strided_slice %228 {offsets = [0, 0, 0], sizes = [2, 8, 8], strides = [1, 1, 1]} : vector<2x8x32xf32> to vector<2x8x8xf32>
    %236 = vector.extract_strided_slice %230 {offsets = [0, 0, 0], sizes = [2, 8, 8], strides = [1, 1, 1]} : vector<2x8x32xf32> to vector<2x8x8xf32>
    "tpu.trace_start"() <{level = 10 : i32, message = "bqd,bkd->bqk"}> : () -> ()
    %cst_106 = arith.constant dense<0.000000e+00> : vector<2x8x8xf32>
    %237 = tpu.matmul %234, %235, %cst_106 {dimension_numbers = #tpu.dot_dimension_numbers<[2], [2], [1], [1], [0, 0, 0, 1, 1, 1], [0], [0]>} : vector<2x8x8xf32>, vector<2x8x8xf32>, vector<2x8x8xf32> -> vector<2x8x8xf32>
    "tpu.trace_stop"() : () -> ()
    %cst_107 = arith.constant 0.353553385 : f32
    %238 = vector.broadcast %cst_107 : f32 to vector<2x8x8xf32>
    %239 = arith.mulf %237, %238 : vector<2x8x8xf32>
    %cst_108 = arith.constant dense<0xFF800000> : vector<2x8xf32>
    %240 = vector.multi_reduction <maximumf>, %239, %cst_108 [2] : vector<2x8x8xf32> to vector<2x8xf32>
    %241 = vector.shape_cast %240 : vector<2x8xf32> to vector<2x8x1xf32>
    %242 = vector.broadcast %241 : vector<2x8x1xf32> to vector<2x8x8xf32>
    %243 = arith.subf %239, %242 : vector<2x8x8xf32>
    %244 = math.exp %243 : vector<2x8x8xf32>
    %cst_109 = arith.constant dense<0.000000e+00> : vector<2x8xf32>
    %245 = vector.multi_reduction <add>, %244, %cst_109 [2] : vector<2x8x8xf32> to vector<2x8xf32>
    %246 = vector.shape_cast %245 : vector<2x8xf32> to vector<2x8x1xf32>
    %247 = tpu.reciprocal %246 {approx = true} : vector<2x8x1xf32> -> vector<2x8x1xf32>
    %248 = vector.broadcast %247 : vector<2x8x1xf32> to vector<2x8x8xf32>
    %249 = arith.mulf %244, %248 : vector<2x8x8xf32>
    "tpu.trace_start"() <{level = 10 : i32, message = "bqk,bkd->bqd"}> : () -> ()
    %cst_110 = arith.constant dense<0.000000e+00> : vector<2x8x8xf32>
    %250 = tpu.matmul %249, %236, %cst_110 {dimension_numbers = #tpu.dot_dimension_numbers<[2], [1], [1], [2], [0, 0, 0, 1, 1, 2], [0], [0]>} : vector<2x8x8xf32>, vector<2x8x8xf32>, vector<2x8x8xf32> -> vector<2x8x8xf32>
    "tpu.trace_stop"() : () -> ()
    %251 = vector.shape_cast %250 : vector<2x8x8xf32> to vector<16x8xf32>
    %252 = vector.extract_strided_slice %232 {offsets = [0, 0], sizes = [8, 32], strides = [1, 1]} : vector<32x32xf32> to vector<8x32xf32>
    %cst_111 = arith.constant dense<0.000000e+00> : vector<16x32xf32>
    %253 = tpu.matmul %251, %252, %cst_111 {dimension_numbers = #tpu.dot_dimension_numbers<[1], [0], [0], [1], [0, 0, 1, 1], [], []>} : vector<16x8xf32>, vector<8x32xf32>, vector<16x32xf32> -> vector<16x32xf32>
    %254 = arith.addf %233, %253 : vector<16x32xf32>
    %255 = vector.extract_strided_slice %226 {offsets = [0, 0, 8], sizes = [2, 8, 8], strides = [1, 1, 1]} : vector<2x8x32xf32> to vector<2x8x8xf32>
    %256 = vector.extract_strided_slice %228 {offsets = [0, 0, 8], sizes = [2, 8, 8], strides = [1, 1, 1]} : vector<2x8x32xf32> to vector<2x8x8xf32>
    %257 = vector.extract_strided_slice %230 {offsets = [0, 0, 8], sizes = [2, 8, 8], strides = [1, 1, 1]} : vector<2x8x32xf32> to vector<2x8x8xf32>
    "tpu.trace_start"() <{level = 10 : i32, message = "bqd,bkd->bqk"}> : () -> ()
    %cst_112 = arith.constant dense<0.000000e+00> : vector<2x8x8xf32>
    %258 = tpu.matmul %255, %256, %cst_112 {dimension_numbers = #tpu.dot_dimension_numbers<[2], [2], [1], [1], [0, 0, 0, 1, 1, 1], [0], [0]>} : vector<2x8x8xf32>, vector<2x8x8xf32>, vector<2x8x8xf32> -> vector<2x8x8xf32>
    "tpu.trace_stop"() : () -> ()
    %cst_113 = arith.constant 0.353553385 : f32
    %259 = vector.broadcast %cst_113 : f32 to vector<2x8x8xf32>
    %260 = arith.mulf %258, %259 : vector<2x8x8xf32>
    %cst_114 = arith.constant dense<0xFF800000> : vector<2x8xf32>
    %261 = vector.multi_reduction <maximumf>, %260, %cst_114 [2] : vector<2x8x8xf32> to vector<2x8xf32>
    %262 = vector.shape_cast %261 : vector<2x8xf32> to vector<2x8x1xf32>
    %263 = vector.broadcast %262 : vector<2x8x1xf32> to vector<2x8x8xf32>
    %264 = arith.subf %260, %263 : vector<2x8x8xf32>
    %265 = math.exp %264 : vector<2x8x8xf32>
    %cst_115 = arith.constant dense<0.000000e+00> : vector<2x8xf32>
    %266 = vector.multi_reduction <add>, %265, %cst_115 [2] : vector<2x8x8xf32> to vector<2x8xf32>
    %267 = vector.shape_cast %266 : vector<2x8xf32> to vector<2x8x1xf32>
    %268 = tpu.reciprocal %267 {approx = true} : vector<2x8x1xf32> -> vector<2x8x1xf32>
    %269 = vector.broadcast %268 : vector<2x8x1xf32> to vector<2x8x8xf32>
    %270 = arith.mulf %265, %269 : vector<2x8x8xf32>
    "tpu.trace_start"() <{level = 10 : i32, message = "bqk,bkd->bqd"}> : () -> ()
    %cst_116 = arith.constant dense<0.000000e+00> : vector<2x8x8xf32>
    %271 = tpu.matmul %270, %257, %cst_116 {dimension_numbers = #tpu.dot_dimension_numbers<[2], [1], [1], [2], [0, 0, 0, 1, 1, 2], [0], [0]>} : vector<2x8x8xf32>, vector<2x8x8xf32>, vector<2x8x8xf32> -> vector<2x8x8xf32>
    "tpu.trace_stop"() : () -> ()
    %272 = vector.shape_cast %271 : vector<2x8x8xf32> to vector<16x8xf32>
    %273 = vector.extract_strided_slice %232 {offsets = [8, 0], sizes = [8, 32], strides = [1, 1]} : vector<32x32xf32> to vector<8x32xf32>
    %cst_117 = arith.constant dense<0.000000e+00> : vector<16x32xf32>
    %274 = tpu.matmul %272, %273, %cst_117 {dimension_numbers = #tpu.dot_dimension_numbers<[1], [0], [0], [1], [0, 0, 1, 1], [], []>} : vector<16x8xf32>, vector<8x32xf32>, vector<16x32xf32> -> vector<16x32xf32>
    %275 = arith.addf %254, %274 : vector<16x32xf32>
    %276 = vector.extract_strided_slice %226 {offsets = [0, 0, 16], sizes = [2, 8, 8], strides = [1, 1, 1]} : vector<2x8x32xf32> to vector<2x8x8xf32>
    %277 = vector.extract_strided_slice %228 {offsets = [0, 0, 16], sizes = [2, 8, 8], strides = [1, 1, 1]} : vector<2x8x32xf32> to vector<2x8x8xf32>
    %278 = vector.extract_strided_slice %230 {offsets = [0, 0, 16], sizes = [2, 8, 8], strides = [1, 1, 1]} : vector<2x8x32xf32> to vector<2x8x8xf32>
    "tpu.trace_start"() <{level = 10 : i32, message = "bqd,bkd->bqk"}> : () -> ()
    %cst_118 = arith.constant dense<0.000000e+00> : vector<2x8x8xf32>
    %279 = tpu.matmul %276, %277, %cst_118 {dimension_numbers = #tpu.dot_dimension_numbers<[2], [2], [1], [1], [0, 0, 0, 1, 1, 1], [0], [0]>} : vector<2x8x8xf32>, vector<2x8x8xf32>, vector<2x8x8xf32> -> vector<2x8x8xf32>
    "tpu.trace_stop"() : () -> ()
    %cst_119 = arith.constant 0.353553385 : f32
    %280 = vector.broadcast %cst_119 : f32 to vector<2x8x8xf32>
    %281 = arith.mulf %279, %280 : vector<2x8x8xf32>
    %cst_120 = arith.constant dense<0xFF800000> : vector<2x8xf32>
    %282 = vector.multi_reduction <maximumf>, %281, %cst_120 [2] : vector<2x8x8xf32> to vector<2x8xf32>
    %283 = vector.shape_cast %282 : vector<2x8xf32> to vector<2x8x1xf32>
    %284 = vector.broadcast %283 : vector<2x8x1xf32> to vector<2x8x8xf32>
    %285 = arith.subf %281, %284 : vector<2x8x8xf32>
    %286 = math.exp %285 : vector<2x8x8xf32>
    %cst_121 = arith.constant dense<0.000000e+00> : vector<2x8xf32>
    %287 = vector.multi_reduction <add>, %286, %cst_121 [2] : vector<2x8x8xf32> to vector<2x8xf32>
    %288 = vector.shape_cast %287 : vector<2x8xf32> to vector<2x8x1xf32>
    %289 = tpu.reciprocal %288 {approx = true} : vector<2x8x1xf32> -> vector<2x8x1xf32>
    %290 = vector.broadcast %289 : vector<2x8x1xf32> to vector<2x8x8xf32>
    %291 = arith.mulf %286, %290 : vector<2x8x8xf32>
    "tpu.trace_start"() <{level = 10 : i32, message = "bqk,bkd->bqd"}> : () -> ()
    %cst_122 = arith.constant dense<0.000000e+00> : vector<2x8x8xf32>
    %292 = tpu.matmul %291, %278, %cst_122 {dimension_numbers = #tpu.dot_dimension_numbers<[2], [1], [1], [2], [0, 0, 0, 1, 1, 2], [0], [0]>} : vector<2x8x8xf32>, vector<2x8x8xf32>, vector<2x8x8xf32> -> vector<2x8x8xf32>
    "tpu.trace_stop"() : () -> ()
    %293 = vector.shape_cast %292 : vector<2x8x8xf32> to vector<16x8xf32>
    %294 = vector.extract_strided_slice %232 {offsets = [16, 0], sizes = [8, 32], strides = [1, 1]} : vector<32x32xf32> to vector<8x32xf32>
    %cst_123 = arith.constant dense<0.000000e+00> : vector<16x32xf32>
    %295 = tpu.matmul %293, %294, %cst_123 {dimension_numbers = #tpu.dot_dimension_numbers<[1], [0], [0], [1], [0, 0, 1, 1], [], []>} : vector<16x8xf32>, vector<8x32xf32>, vector<16x32xf32> -> vector<16x32xf32>
    %296 = arith.addf %275, %295 : vector<16x32xf32>
    %297 = vector.extract_strided_slice %226 {offsets = [0, 0, 24], sizes = [2, 8, 8], strides = [1, 1, 1]} : vector<2x8x32xf32> to vector<2x8x8xf32>
    %298 = vector.extract_strided_slice %228 {offsets = [0, 0, 24], sizes = [2, 8, 8], strides = [1, 1, 1]} : vector<2x8x32xf32> to vector<2x8x8xf32>
    %299 = vector.extract_strided_slice %230 {offsets = [0, 0, 24], sizes = [2, 8, 8], strides = [1, 1, 1]} : vector<2x8x32xf32> to vector<2x8x8xf32>
    "tpu.trace_start"() <{level = 10 : i32, message = "bqd,bkd->bqk"}> : () -> ()
    %cst_124 = arith.constant dense<0.000000e+00> : vector<2x8x8xf32>
    %300 = tpu.matmul %297, %298, %cst_124 {dimension_numbers = #tpu.dot_dimension_numbers<[2], [2], [1], [1], [0, 0, 0, 1, 1, 1], [0], [0]>} : vector<2x8x8xf32>, vector<2x8x8xf32>, vector<2x8x8xf32> -> vector<2x8x8xf32>
    "tpu.trace_stop"() : () -> ()
    %cst_125 = arith.constant 0.353553385 : f32
    %301 = vector.broadcast %cst_125 : f32 to vector<2x8x8xf32>
    %302 = arith.mulf %300, %301 : vector<2x8x8xf32>
    %cst_126 = arith.constant dense<0xFF800000> : vector<2x8xf32>
    %303 = vector.multi_reduction <maximumf>, %302, %cst_126 [2] : vector<2x8x8xf32> to vector<2x8xf32>
    %304 = vector.shape_cast %303 : vector<2x8xf32> to vector<2x8x1xf32>
    %305 = vector.broadcast %304 : vector<2x8x1xf32> to vector<2x8x8xf32>
    %306 = arith.subf %302, %305 : vector<2x8x8xf32>
    %307 = math.exp %306 : vector<2x8x8xf32>
    %cst_127 = arith.constant dense<0.000000e+00> : vector<2x8xf32>
    %308 = vector.multi_reduction <add>, %307, %cst_127 [2] : vector<2x8x8xf32> to vector<2x8xf32>
    %309 = vector.shape_cast %308 : vector<2x8xf32> to vector<2x8x1xf32>
    %310 = tpu.reciprocal %309 {approx = true} : vector<2x8x1xf32> -> vector<2x8x1xf32>
    %311 = vector.broadcast %310 : vector<2x8x1xf32> to vector<2x8x8xf32>
    %312 = arith.mulf %307, %311 : vector<2x8x8xf32>
    "tpu.trace_start"() <{level = 10 : i32, message = "bqk,bkd->bqd"}> : () -> ()
    %cst_128 = arith.constant dense<0.000000e+00> : vector<2x8x8xf32>
    %313 = tpu.matmul %312, %299, %cst_128 {dimension_numbers = #tpu.dot_dimension_numbers<[2], [1], [1], [2], [0, 0, 0, 1, 1, 2], [0], [0]>} : vector<2x8x8xf32>, vector<2x8x8xf32>, vector<2x8x8xf32> -> vector<2x8x8xf32>
    "tpu.trace_stop"() : () -> ()
    %314 = vector.shape_cast %313 : vector<2x8x8xf32> to vector<16x8xf32>
    %315 = vector.extract_strided_slice %232 {offsets = [24, 0], sizes = [8, 32], strides = [1, 1]} : vector<32x32xf32> to vector<8x32xf32>
    %cst_129 = arith.constant dense<0.000000e+00> : vector<16x32xf32>
    %316 = tpu.matmul %314, %315, %cst_129 {dimension_numbers = #tpu.dot_dimension_numbers<[1], [0], [0], [1], [0, 0, 1, 1], [], []>} : vector<16x8xf32>, vector<8x32xf32>, vector<16x32xf32> -> vector<16x32xf32>
    %317 = arith.addf %296, %316 : vector<16x32xf32>
    %318 = arith.addf %191, %317 : vector<16x32xf32>
    %c1_130 = arith.constant 1 : index
    %c0_131 = arith.constant 0 : index
    %c0_132 = arith.constant 0 : index
    %319 = vector.load %arg9[%c1_130, %c0_131, %c0_132] : memref<2x1x32xf32, #tpu.memory_space<vmem>>, vector<1x1x32xf32>
    %320 = vector.shape_cast %319 : vector<1x1x32xf32> to vector<1x32xf32>
    %321 = vector.broadcast %320 : vector<1x32xf32> to vector<16x32xf32>
    %322 = arith.addf %318, %321 : vector<16x32xf32>
    %c1_133 = arith.constant 1 : index
    %c0_134 = arith.constant 0 : index
    %c0_135 = arith.constant 0 : index
    %323 = vector.load %arg10[%c1_133, %c0_134, %c0_135] : memref<2x1x32xf32, #tpu.memory_space<vmem>>, vector<1x1x32xf32>
    %324 = vector.shape_cast %323 : vector<1x1x32xf32> to vector<1x32xf32>
    %c1_136 = arith.constant 1 : index
    %c0_137 = arith.constant 0 : index
    %c0_138 = arith.constant 0 : index
    %325 = vector.load %arg11[%c1_136, %c0_137, %c0_138] : memref<2x1x32xf32, #tpu.memory_space<vmem>>, vector<1x1x32xf32>
    %326 = vector.shape_cast %325 : vector<1x1x32xf32> to vector<1x32xf32>
    %cst_139 = arith.constant dense<0.000000e+00> : vector<16xf32>
    %327 = vector.multi_reduction <add>, %322, %cst_139 [1] : vector<16x32xf32> to vector<16xf32>
    %328 = vector.shape_cast %327 : vector<16xf32> to vector<16x1xf32>
    %cst_140 = arith.constant 3.200000e+01 : f32
    %329 = vector.broadcast %cst_140 : f32 to vector<16x1xf32>
    %330 = arith.divf %328, %329 : vector<16x1xf32>
    %331 = vector.broadcast %330 : vector<16x1xf32> to vector<16x32xf32>
    %332 = arith.subf %322, %331 : vector<16x32xf32>
    %333 = arith.mulf %332, %332 : vector<16x32xf32>
    %cst_141 = arith.constant dense<0.000000e+00> : vector<16xf32>
    %334 = vector.multi_reduction <add>, %333, %cst_141 [1] : vector<16x32xf32> to vector<16xf32>
    %335 = vector.shape_cast %334 : vector<16xf32> to vector<16x1xf32>
    %cst_142 = arith.constant 3.200000e+01 : f32
    %336 = vector.broadcast %cst_142 : f32 to vector<16x1xf32>
    %337 = arith.divf %335, %336 : vector<16x1xf32>
    %338 = vector.broadcast %330 : vector<16x1xf32> to vector<16x32xf32>
    %339 = arith.subf %322, %338 : vector<16x32xf32>
    %cst_143 = arith.constant 9.99999974E-6 : f32
    %340 = vector.broadcast %cst_143 : f32 to vector<16x1xf32>
    %341 = arith.addf %337, %340 : vector<16x1xf32>
    %342 = math.rsqrt %341 : vector<16x1xf32>
    %343 = vector.broadcast %342 : vector<16x1xf32> to vector<16x32xf32>
    %344 = arith.mulf %339, %343 : vector<16x32xf32>
    %345 = vector.broadcast %324 : vector<1x32xf32> to vector<16x32xf32>
    %346 = arith.mulf %344, %345 : vector<16x32xf32>
    %347 = vector.broadcast %326 : vector<1x32xf32> to vector<16x32xf32>
    %348 = arith.addf %346, %347 : vector<16x32xf32>
    %c1_144 = arith.constant 1 : index
    %c0_145 = arith.constant 0 : index
    %c0_146 = arith.constant 0 : index
    %349 = vector.load %arg12[%c1_144, %c0_145, %c0_146] : memref<2x32x64xf32, #tpu.memory_space<vmem>>, vector<1x32x64xf32>
    %350 = vector.shape_cast %349 : vector<1x32x64xf32> to vector<32x64xf32>
    %cst_147 = arith.constant dense<0.000000e+00> : vector<16x64xf32>
    %351 = tpu.matmul %348, %350, %cst_147 {dimension_numbers = #tpu.dot_dimension_numbers<[1], [0], [0], [1], [0, 0, 1, 1], [], []>} : vector<16x32xf32>, vector<32x64xf32>, vector<16x64xf32> -> vector<16x64xf32>
    %c1_148 = arith.constant 1 : index
    %c0_149 = arith.constant 0 : index
    %c0_150 = arith.constant 0 : index
    %352 = vector.load %arg13[%c1_148, %c0_149, %c0_150] : memref<2x1x64xf32, #tpu.memory_space<vmem>>, vector<1x1x64xf32>
    %353 = vector.shape_cast %352 : vector<1x1x64xf32> to vector<1x64xf32>
    %354 = vector.broadcast %353 : vector<1x64xf32> to vector<16x64xf32>
    %355 = arith.addf %351, %354 : vector<16x64xf32>
    %cst_151 = arith.constant 5.000000e-01 : f32
    %356 = vector.broadcast %cst_151 : f32 to vector<16x64xf32>
    %357 = arith.mulf %356, %355 : vector<16x64xf32>
    %cst_152 = arith.constant 0.707106769 : f32
    %358 = vector.broadcast %cst_152 : f32 to vector<16x64xf32>
    %359 = arith.mulf %355, %358 : vector<16x64xf32>
    %360 = math.erf %359 : vector<16x64xf32>
    %cst_153 = arith.constant 1.000000e+00 : f32
    %361 = vector.broadcast %cst_153 : f32 to vector<16x64xf32>
    %362 = arith.addf %361, %360 : vector<16x64xf32>
    %363 = arith.mulf %357, %362 : vector<16x64xf32>
    %c1_154 = arith.constant 1 : index
    %c0_155 = arith.constant 0 : index
    %c0_156 = arith.constant 0 : index
    %364 = vector.load %arg14[%c1_154, %c0_155, %c0_156] : memref<2x64x32xf32, #tpu.memory_space<vmem>>, vector<1x64x32xf32>
    %365 = vector.shape_cast %364 : vector<1x64x32xf32> to vector<64x32xf32>
    %cst_157 = arith.constant dense<0.000000e+00> : vector<16x32xf32>
    %366 = tpu.matmul %363, %365, %cst_157 {dimension_numbers = #tpu.dot_dimension_numbers<[1], [0], [0], [1], [0, 0, 1, 1], [], []>} : vector<16x64xf32>, vector<64x32xf32>, vector<16x32xf32> -> vector<16x32xf32>
    %c1_158 = arith.constant 1 : index
    %c0_159 = arith.constant 0 : index
    %c0_160 = arith.constant 0 : index
    %367 = vector.load %arg15[%c1_158, %c0_159, %c0_160] : memref<2x1x32xf32, #tpu.memory_space<vmem>>, vector<1x1x32xf32>
    %368 = vector.shape_cast %367 : vector<1x1x32xf32> to vector<1x32xf32>
    %369 = vector.broadcast %368 : vector<1x32xf32> to vector<16x32xf32>
    %370 = arith.addf %366, %369 : vector<16x32xf32>
    %371 = arith.addf %322, %370 : vector<16x32xf32>
    %372 = vector.extract_strided_slice %371 {offsets = [7, 0], sizes = [1, 32], strides = [1, 1]} : vector<16x32xf32> to vector<1x32xf32>
    %373 = vector.extract_strided_slice %371 {offsets = [15, 0], sizes = [1, 32], strides = [1, 1]} : vector<16x32xf32> to vector<1x32xf32>
    %374 = tpu.concatenate %372, %373 in 0 : vector<1x32xf32>, vector<1x32xf32> -> vector<2x32xf32>
    %c0_161 = arith.constant 0 : index
    %c0_162 = arith.constant 0 : index
    %375 = vector.load %arg16[%c0_161, %c0_162] : memref<32x24xf32, #tpu.memory_space<vmem>>, vector<32x24xf32>
    %cst_163 = arith.constant dense<0.000000e+00> : vector<2x24xf32>
    %376 = tpu.matmul %374, %375, %cst_163 {dimension_numbers = #tpu.dot_dimension_numbers<[1], [0], [0], [1], [0, 0, 1, 1], [], []>} : vector<2x32xf32>, vector<32x24xf32>, vector<2x24xf32> -> vector<2x24xf32>
    %c0_164 = arith.constant 0 : index
    %c0_165 = arith.constant 0 : index
    %377 = vector.load %arg17[%c0_164, %c0_165] : memref<1x24xf32, #tpu.memory_space<vmem>>, vector<1x24xf32>
    %378 = vector.shape_cast %377 : vector<1x24xf32> to vector<24xf32>
    %379 = vector.shape_cast %378 : vector<24xf32> to vector<1x24xf32>
    %380 = vector.broadcast %379 : vector<1x24xf32> to vector<2x24xf32>
    %381 = arith.addf %376, %380 : vector<2x24xf32>
    %c0_166 = arith.constant 0 : index
    %c0_167 = arith.constant 0 : index
    %382 = vector.load %arg18[%c0_166, %c0_167] : memref<2x24xf32, #tpu.memory_space<vmem>>, vector<2x24xf32>
    tpu.vector_store %arg18[%c0_166, %c0_167], %381 {strides = array<i32>} : memref<2x24xf32, #tpu.memory_space<vmem>>, vector<2x24xf32>,
    return
  }
}

</mosaic_0001>

<bundles_post_ra>
// kernel: tpu_custom_call.1
= control target key start
LH: loop header
LB: loop body
LE: loop exit
PB: predicated region body
PF: predicated region fallthrough
CT: control target
= control target key end

     0   :  { %s5855_s0 = inlined_call_operand.vmem [shape: f32[16,4], index: 0, kind: input, shape index: {}]   ;;  %s5856_s1 = inlined_call_operand.vmem [shape: f32[16,32], index: 1, kind: input, shape index: {}]   ;;  %s5857_s2 = inlined_call_operand.vmem [shape: f32[4,32], index: 2, kind: input, shape index: {}]   ;;  %s5858_s3 = inlined_call_operand.vmem [shape: f32[1,32], index: 3, kind: input, shape index: {}]   ;;  %s5859_s4 = inlined_call_operand.vmem [shape: f32[2,1,32], index: 4, kind: input, shape index: {}]   ;;  %s5860_s5 = inlined_call_operand.vmem [shape: f32[2,1,32], index: 5, kind: input, shape index: {}]   ;;  %s5861_s6 = inlined_call_operand.vmem [shape: f32[2,32,96], index: 6, kind: input, shape index: {}]   ;;  %s5862_s7 = inlined_call_operand.vmem [shape: f32[2,1,96], index: 7, kind: input, shape index: {}]   ;;  %s5863_s8 = inlined_call_operand.vmem [shape: f32[2,32,32], index: 8, kind: input, shape index: {}]   ;;  %s5864_s9 = inlined_call_operand.vmem [shape: f32[2,1,32], index: 9, kind: input, shape index: {}]   ;;  %s5865_s10 = inlined_call_operand.vmem [shape: f32[2,1,32], index: 10, kind: input, shape index: {}]   ;;  %s5866_s11 = inlined_call_operand.vmem [shape: f32[2,1,32], index: 11, kind: input, shape index: {}]   ;;  %s5867_s12 = inlined_call_operand.vmem [shape: f32[2,32,64], index: 12, kind: input, shape index: {}]   ;;  %s5868_s13 = inlined_call_operand.vmem [shape: f32[2,1,64], index: 13, kind: input, shape index: {}]   ;;  %s5869_s14 = inlined_call_operand.vmem [shape: f32[2,64,32], index: 14, kind: input, shape index: {}]   ;;  %s5870_s15 = inlined_call_operand.vmem [shape: f32[2,1,32], index: 15, kind: input, shape index: {}]   ;;  %s5871_s16 = inlined_call_operand.vmem [shape: f32[32,24], index: 16, kind: input, shape index: {}]   ;;  %s5872_s17 = inlined_call_operand.vmem [shape: f32[1,24], index: 17, kind: input, shape index: {}]   ;;  %s5873_s18 = inlined_call_operand.hbm [shape: f32[2,24], index: 18, kind: output, shape index: {}]  }
   0x1   :  { %5882 = sst [smem:[#allocation5_spill]] %s5855_s0 }
   0x2   :  { %5883 = sst [smem:[#allocation6_spill]] %s5856_s1 }
   0x3   :  { %5884 = sst [smem:[#allocation7_spill]] %s5857_s2 }
   0x4   :  { %s5885_s29 = sld [smem:[#allocation7_spill]]  ;;  %vm77_vm0 = vcmask 1043456   ;;  %s5886_s19 = sld [smem:[#allocation5_spill]]  ;;  %vm70_vm1 = vcmask 31744  }
   0xa   :  { %v62_v0 = vld [vmem:[%s5885_s29] sm:$0xf]  ;;  %v61_v2 = vld [vmem:[%s5886_s19 + $0x8] sm:$0xff] }
   0xb   :  { %v60_v1 = vld [vmem:[%s5886_s19] sm:$0xff]  ;;  %4650 = vmatprep.subr.msk.mxu0 %vm77_vm0, %v62_v0 }
   0xc   :  { %4652 = vmatprep.mubr.msk.f32.mxu0 %vm70_vm1, %v60_v1 }
   0xd   :  { %23 = vsyncpa [#allocation3], 0  ;;  %4651 = vmatpush3.msk.msra.mxu0 %vm77_vm0, %v62_v0  ;;  %v4384_v3 = vld [vmem:[%s5858_s3] ss:$0 sm:$0xff]  ;;  %s5887_s24 = sld [smem:[#allocation6_spill]]  ;;  %vm164_vm2 = vcmask 261120  }
   0xe   :  { %4653 = vmatmul.mubr.msk.f32.vlgmr.msra.gmra.mrb[0].mxu0 %vm70_vm1, %v61_v2  ;;  %v208_v26 = vld [vmem:[%s5861_s6] sm:$0xff]  ;;  %v209_v27 = vld [vmem:[%s5861_s6 + $0x8] sm:$0xff]  ;;  %v210_v28 = vld [vmem:[%s5861_s6 + $0x10] sm:$0xff]  ;;  %v5157_v48 = vmov 0.0   ;;  %vm5158_vm3 = vmmov 0   ;;  %s5159_s25 = smov 96  }
   0xf   :  { %v4948_v29 = vpack.c.bf16 %v209_v27, %v208_v26  ;;  %v211_v30 = vld [vmem:[%s5861_s6 + $0x18] sm:$0xff]  ;;  %v4388_v39 = vld [vmem:[%s5859_s4] ss:$0 sm:$0xff]  ;;  %4666 = vmatprep.subr.mxu0 %v5157_v48  ;;  %4668 = vmatprep.mubr.msk.f32.mxu0 %vm5158_vm3, %v5157_v48  ;;  %vm307_vm4 = vcmask 64512   ;;  %s5160_s26 = smov 64   ;;  %s5161_s3 = smov 88  }
  0x10   :  { %v4952_v31 = vpack.c.bf16 %v211_v30, %v210_v28  ;;  %v4389_v41 = vld [vmem:[%s5860_s5] ss:$0 sm:$0xff]  ;;  %s5162_s27 = smov 120   ;;  %s5163_s28 = smov 80   ;;  %vm2131_vm5 = vcmask 523264   ;;  %vm4282_vm6 = vcmask 1040384  }
  0x11   :  { %4949 = vmatprep.subr.bf16.mxu1 %v4948_v29  ;;  %v4390_v49 = vld [vmem:[%s5862_s7] ss:$0 sm:$0xff]  ;;  %s5164_s29 = smov 56   ;;  %s5165_s30 = smov 112   ;;  %vm4368_vm7 = vcmask 189440  }
  0x12   :  { %4951 = vmatpush3.bf16.msra.mxu1 %v4948_v29  ;;  %s5166_s0 = smov 48   ;;  %s5880_s19 = smov 72  }
  0x13   :  { %v158_v8 = vld [vmem:[%s5887_s24] sm:$0xff]  ;;  %v159_v11 = vld [vmem:[%s5887_s24 + $0x8] sm:$0xff]  ;;  %4953 = vmatprep.subr.bf16.mxu1 %v4952_v31  ;;  %s5878_s1 = smov 104   ;;  %s5876_s20 = smov 40  }
  0x16   :  { %4955 = vmatpush3.bf16.msra.mxu1 %v4952_v31 }
  0x17   :  { %4686 = vmatprep.subr.mxu1 %v5157_v48 }
  0xe1   :  { %v4654_v4 = vpop.f32.mrb[0].mxu0 }
  0xe2   :  { %v153_v5 = vadd.f32 %v4654_v4, %v4384_v3  ;;  %v147_v6 = vpop.f32.mrb[1].mxu0 }
  0xe3   :  { %v148_v7 = vadd.f32 %v4384_v3, %v147_v6 }
  0xe4   :  { %v157_v9 = vmul.f32 5.656854, %v153_v5 }
  0xe5   :  { %v156_v10 = vmul.f32 5.656854, %v148_v7 }
  0xe6   :  { %v5287_v13 = vadd.f32 %v159_v11, %v157_v9 }
  0xe7   :  { %v5285_v12 = vadd.f32 %v158_v8, %v156_v10 }
  0xe8   :  { %v168_v15 = vsel %vm164_vm2, %v5287_v13, 0.0 }
  0xe9   :  { %v165_v14 = vsel %vm164_vm2, %v5285_v12, 0.0 }
  0xea   :  { %166 = vadd.xlane.f32.xlu0 %v165_v14 }
  0xee   :  { %169 = vadd.xlane.f32.xlu0 %v168_v15 }
 0x177   :  { %v167_v16 = vpop.xlane.xlu0 %166 }
 0x178   :  { %v172_v17 = vmul.f32 0.03125, %v167_v16 }
 0x17a   :  { %v174_v18 = vsub.f32 %v5285_v12, %v172_v17 }
 0x17b   :  { %v170_v19 = vpop.xlane.xlu0 %169 }
 0x17c   :  { %v173_v20 = vmul.f32 0.03125, %v170_v19  ;;  %v176_v21 = vmul.f32 %v174_v18, %v174_v18 }
 0x17e   :  { %v175_v22 = vsub.f32 %v5287_v13, %v173_v20  ;;  %v178_v23 = vsel %vm164_vm2, %v176_v21, 0.0 }
 0x17f   :  { %179 = vadd.xlane.f32.xlu1 %v178_v23 }
 0x180   :  { %v177_v24 = vmul.f32 %v175_v22, %v175_v22 }
 0x182   :  { %v181_v25 = vsel %vm164_vm2, %v177_v24, 0.0 }
 0x183   :  { %182 = vadd.xlane.f32.xlu1 %v181_v25 }
 0x20c   :  { %v180_v32 = vpop.xlane.xlu1 %179 }
 0x20d   :  { %v184_v33 = vmul.f32 0.03125, %v180_v32 }
 0x20f   :  { %v186_v34 = vadd.f32 1e-05, %v184_v33 }
 0x210   :  { %v183_v35 = vpop.xlane.xlu1 %182 }
 0x211   :  { %5045 = vrsqrt.f32 %v186_v34  ;;  %v185_v36 = vmul.f32 0.03125, %v183_v35 }
 0x213   :  { %v187_v37 = vadd.f32 1e-05, %v185_v36 }
 0x215   :  { %5047 = vrsqrt.f32 %v187_v37 }
 0x21b   :  { %v5046_v38 = vpop.eup %5045 }
 0x21c   :  { %v190_v40 = vmul.f32 %v5046_v38, %v174_v18 }
 0x21e   :  { %v198_v42 = vmul.f32 %v4388_v39, %v190_v40 }
 0x21f   :  { %v5048_v43 = vpop.eup %5047 }
 0x220   :  { %v191_v44 = vmul.f32 %v5048_v43, %v175_v22  ;;  %v206_v45 = vadd.f32 %v4389_v41, %v198_v42 }
 0x222   :  { %v199_v46 = vmul.f32 %v4388_v39, %v191_v44  ;;  %4663 = vmatprep.mubr.msk.f32.mxu1 %vm164_vm2, %v206_v45 }
 0x224   :  { %v207_v47 = vadd.f32 %v4389_v41, %v199_v46 }
 0x226   :  { %4664 = vmatmul.mubr.msk.f32.vlgmr.msra.gmra.mrb[0].mxu1 %vm164_vm2, %v207_v47 }
 0x227   :  { %4688 = vmatprep.mubr.msk.f32.mxu1 %vm5158_vm3, %v5157_v48 }
 0x2f9   :  { %v4665_v50 = vpop.f32.mrb[0].mxu1 }
 0x2fa   :  { %v5326_v51 = vadd.f32 %v4665_v50, %v4390_v49  ;;  %v291_v52 = vpop.f32.mrb[1].mxu1 }
 0x2fb   :  { %v5328_v53 = vadd.f32 %v4390_v49, %v291_v52 }
 0x2fc   :  { %383 = vrot.lane.b32.xlu1 %v5326_v51, %s5159_s25 }
 0x2fd   :  { %305 = vrot.lane.b32.xlu0 %v5328_v53, %s5159_s25 }
 0x36e   :  { %v384_v55 = vpop.permute.xlu1 %383 }
 0x36f   :  { %v306_v54 = vpop.permute.xlu0 %305 }
 0x370   :  { %4667 = vmatpush3.xpose.msk.msra.mxu0 %vm307_vm4, %v306_v54 }
 0x371   :  { %4671 = vmatprep.subr.mxu0 %v5157_v48 }
 0x373   :  { %4669 = vmatmul.mubr.msk.f32.vlgmr.msra.gmra.mrb[2].mxu0 %vm307_vm4, %v5328_v53 }
 0x374   :  { %4672 = vmatpush3.xpose.msk.msra.mxu0 %vm307_vm4, %v384_v55  ;;  %4673 = vmatprep.mubr.msk.f32.mxu0 %vm5158_vm3, %v5157_v48 }
 0x375   :  { %4676 = vmatprep.subr.mxu0 %v5157_v48 }
 0x377   :  { %4674 = vmatmul.mubr.msk.f32.vlgmr.msra.gmra.mrb[4].mxu0 %vm307_vm4, %v5326_v51 }
 0x378   :  { %4678 = vmatprep.mubr.msk.f32.mxu0 %vm5158_vm3, %v5157_v48 }
 0x446   :  { %v378_v56 = vpop.f32.mrb[2].mxu0 }
 0x447   :  { %v459_v57 = vmul.f32 0.35355338, %v378_v56  ;;  %v4670_v58 = vpop.f32.mrb[3].mxu0 }
 0x449   :  { %v461_v59 = vsel %vm307_vm4, %v459_v57, -inf }
 0x44a   :  { %462 = vmax.xlane.f32.xlu1 %v461_v59  ;;  %v455_v60 = vpop.f32.mrb[4].mxu0 }
 0x44b   :  { %v460_v61 = vmul.f32 0.35355338, %v455_v60  ;;  %v4675_v62 = vpop.f32.mrb[5].mxu0 }
 0x44d   :  { %v464_v63 = vsel %vm307_vm4, %v460_v61, -inf }
 0x44e   :  { %465 = vmax.xlane.f32.xlu0 %v464_v63 }
 0x45b   :  { %559 = vrot.lane.b32.xlu1 %v5326_v51, %s5160_s26 }
 0x45f   :  { %715 = vrot.lane.b32.xlu1 %v5326_v51, %s5161_s3 }
 0x4d7   :  { %v463_v0 = vpop.xlane.xlu1 %462 }
 0x4d8   :  { %v467_v1 = vsub.f32 %v459_v57, %v463_v0 }
 0x4da   :  { %v469_v2 = vmul.f32 1.442695, %v467_v1 }
 0x4db   :  { %v466_v3 = vpop.xlane.xlu0 %465  ;;  %v560_v10 = vpop.permute.xlu1 %559 }
 0x4dc   :  { %5049 = vpow2.f32 %v469_v2  ;;  %v468_v4 = vsub.f32 %v460_v61, %v466_v3 }
 0x4de   :  { %v471_v5 = vmul.f32 1.442695, %v468_v4 }
 0x4df   :  { %v716_v11 = vpop.permute.xlu1 %715 }
 0x4e0   :  { %5051 = vpow2.f32 %v471_v5 }
 0x4e6   :  { %v5050_v6 = vpop.eup %5049 }
 0x4e7   :  { %v473_v7 = vsel %vm307_vm4, %v5050_v6, 0.0 }
 0x4e8   :  { %474 = vadd.xlane.f32.xlu0 %v473_v7 }
 0x4ea   :  { %v5052_v8 = vpop.eup %5051 }
 0x4eb   :  { %v476_v9 = vsel %vm307_vm4, %v5052_v8, 0.0 }
 0x4ec   :  { %477 = vadd.xlane.f32.xlu1 %v476_v9  ;;  %v300_v9 = vld [vmem:[%s5863_s8] sm:$0xff] }
 0x4fd   :  { %713 = vrot.lane.b32.xlu1 %v5326_v51, %s5162_s27 }
 0x4fe   :  { %483 = vrot.lane.b32.xlu0 %v5328_v53, %s5160_s26 }
 0x501   :  { %635 = vrot.lane.b32.xlu1 %v5328_v53, %s5162_s27 }
 0x502   :  { %637 = vrot.lane.b32.xlu0 %v5328_v53, %s5161_s3 }
 0x505   :  { %1131 = vrot.lane.b32.xlu1 %v5328_v53, %s5163_s28 }
 0x575   :  { %v475_v14 = vpop.xlane.xlu0 %474 }
 0x576   :  { %5053 = vrcp.f32 %v475_v14 }
 0x579   :  { %v478_v15 = vpop.xlane.xlu1 %477  ;;  %v484_v16 = vpop.permute.xlu0 %483 }
 0x57a   :  { %5055 = vrcp.f32 %v478_v15  ;;  %4677 = vmatpush3.msra.mxu0 %v484_v16 }
 0x57b   :  { %4681 = vmatprep.subr.mxu0 %v5157_v48 }
 0x57d   :  { %v714_v17 = vpop.permute.xlu1 %713  ;;  %v638_v18 = vpop.permute.xlu0 %637 }
 0x57e   :  { %4687 = vmatpush3.xpose.msk.msra.mxu1 %vm307_vm4, %v638_v18 }
 0x57f   :  { %4696 = vmatprep.subr.mxu1 %v5157_v48 }
 0x580   :  { %v5054_v19 = vpop.eup %5053 }
 0x581   :  { %v481_v20 = vmul.f32 %v5054_v19, %v5050_v6  ;;  %v636_v21 = vpop.permute.xlu1 %635 }
 0x582   :  { %4689 = vmatmul.mubr.msk.f32.vlgmr.msra.gmra.mrb[2].mxu1 %vm307_vm4, %v636_v21 }
 0x583   :  { %4679 = vmatmul.mubr.msk.f32.vlgmr.msra.gmra.mrb[6].mxu0 %vm307_vm4, %v481_v20  ;;  %4698 = vmatprep.mubr.msk.f32.mxu1 %vm5158_vm3, %v5157_v48 }
 0x584   :  { %v5056_v22 = vpop.eup %5055  ;;  %4682 = vmatpush3.msra.mxu0 %v560_v10  ;;  %4683 = vmatprep.mubr.msk.f32.mxu0 %vm5158_vm3, %v5157_v48 }
 0x585   :  { %v482_v23 = vmul.f32 %v5056_v22, %v5052_v8  ;;  %4691 = vmatprep.subr.mxu0 %v5157_v48  ;;  %v1132_v42 = vpop.permute.xlu1 %1131  ;;  %v301_v8 = vld [vmem:[%s5863_s8 + $0x8] sm:$0xff] }
 0x587   :  { %4684 = vmatmul.mubr.msk.f32.vlgmr.msra.gmra.mrb[8].mxu0 %vm307_vm4, %v482_v23 }
 0x588   :  { %4693 = vmatprep.mubr.msk.f32.mxu0 %vm5158_vm3, %v5157_v48 }
 0x58b   :  { %4692 = vmatpush3.xpose.msk.msra.mxu0 %vm307_vm4, %v716_v11 }
 0x58c   :  { %4701 = vmatprep.subr.mxu0 %v5157_v48 }
 0x58e   :  { %4694 = vmatmul.mubr.msk.f32.vlgmr.msra.gmra.mrb[10].mxu0 %vm307_vm4, %v714_v17 }
 0x58f   :  { %4703 = vmatprep.mubr.msk.f32.mxu0 %vm5158_vm3, %v5157_v48 }
 0x655   :  { %v709_v24 = vpop.f32.mrb[2].mxu1 }
 0x656   :  { %v5382_v25 = vpop.f32.mrb[6].mxu0  ;;  %v4690_v26 = vpop.f32.mrb[3].mxu1  ;;  %v791_v40 = vmul.f32 0.35355338, %v709_v24 }
 0x657   :  { %v4680_v27 = vpop.f32.mrb[7].mxu0 }
 0x658   :  { %v793_v41 = vsel %vm307_vm4, %v791_v40, -inf  ;;  %v302_v27 = vld [vmem:[%s5863_s8 + $0x10] sm:$0xff] }
 0x65a   :  { %v5384_v28 = vpop.f32.mrb[8].mxu0 }
 0x65b   :  { %v4685_v29 = vpop.f32.mrb[9].mxu0 }
 0x661   :  { %v787_v30 = vpop.f32.mrb[10].mxu0 }
 0x662   :  { %v792_v31 = vmul.f32 0.35355338, %v787_v30  ;;  %v4695_v32 = vpop.f32.mrb[11].mxu0 }
 0x664   :  { %v796_v33 = vsel %vm307_vm4, %v792_v31, -inf }
 0x665   :  { %797 = vmax.xlane.f32.xlu0 %v796_v33 }
 0x67b   :  { %891 = vrot.lane.b32.xlu0 %v5326_v51, %s5164_s29 }
 0x67f   :  { %1129 = vrot.lane.b32.xlu0 %v5328_v53, %s5165_s30 }
 0x683   :  { %1207 = vrot.lane.b32.xlu0 %v5326_v51, %s5165_s30 }
 0x6f2   :  { %v798_v34 = vpop.xlane.xlu0 %797 }
 0x6f3   :  { %v800_v35 = vsub.f32 %v792_v31, %v798_v34 }
 0x6f5   :  { %v803_v36 = vmul.f32 1.442695, %v800_v35 }
 0x6f6   :  { %v892_v37 = vpop.permute.xlu0 %891 }
 0x6f7   :  { %5057 = vpow2.f32 %v803_v36  ;;  %4702 = vmatpush3.msra.mxu0 %v892_v37 }
 0x6f8   :  { %4716 = vmatprep.subr.mxu0 %v5157_v48 }
 0x6fa   :  { %v1130_v46 = vpop.permute.xlu0 %1129 }
 0x6fe   :  { %v1208_v49 = vpop.permute.xlu0 %1207 }
 0x701   :  { %v5058_v38 = vpop.eup %5057 }
 0x702   :  { %v808_v39 = vsel %vm307_vm4, %v5058_v38, 0.0 }
 0x703   :  { %809 = vadd.xlane.f32.xlu1 %v808_v39 }
 0x714   :  { %1209 = vrot.lane.b32.xlu1 %v5326_v51, %s5163_s28 }
 0x738   :  { %794 = vmax.xlane.f32.xlu1 %v793_v41 }
 0x790   :  { %v810_v43 = vpop.xlane.xlu1 %809 }
 0x791   :  { %5059 = vrcp.f32 %v810_v43 }
 0x794   :  { %v1210_v47 = vpop.permute.xlu1 %1209 }
 0x79b   :  { %v5060_v44 = vpop.eup %5059 }
 0x79c   :  { %v814_v45 = vmul.f32 %v5060_v44, %v5058_v38 }
 0x79e   :  { %4704 = vmatmul.mubr.msk.f32.vlgmr.msra.gmra.mrb[12].mxu0 %vm307_vm4, %v814_v45 }
 0x79f   :  { %4717 = vmatpush3.xpose.msk.msra.mxu0 %vm307_vm4, %v1132_v42  ;;  %4718 = vmatprep.mubr.msk.f32.mxu0 %vm5158_vm3, %v5157_v48 }
 0x7a0   :  { %4721 = vmatprep.subr.mxu0 %v5157_v48 }
 0x7a2   :  { %4719 = vmatmul.mubr.msk.f32.vlgmr.msra.gmra.mrb[14].mxu0 %vm307_vm4, %v1130_v46 }
 0x7a3   :  { %4722 = vmatpush3.xpose.msk.msra.mxu0 %vm307_vm4, %v1210_v47  ;;  %4723 = vmatprep.mubr.msk.f32.mxu0 %vm5158_vm3, %v5157_v48 }
 0x7a4   :  { %4731 = vmatprep.subr.mxu0 %v5157_v48 }
 0x7a6   :  { %4724 = vmatmul.mubr.msk.f32.vlgmr.msra.gmra.mrb[16].mxu0 %vm307_vm4, %v1208_v49 }
 0x7a7   :  { %4733 = vmatprep.mubr.msk.f32.mxu0 %vm5158_vm3, %v5157_v48 }
 0x7c5   :  { %v795_v50 = vpop.xlane.xlu1 %794 }
 0x7c6   :  { %v799_v52 = vsub.f32 %v791_v40, %v795_v50 }
 0x7c8   :  { %v801_v54 = vmul.f32 1.442695, %v799_v52 }
 0x7ca   :  { %5061 = vpow2.f32 %v801_v54 }
 0x7d4   :  { %v5062_v55 = vpop.eup %5061 }
 0x7d5   :  { %v805_v56 = vsel %vm307_vm4, %v5062_v55, 0.0 }
 0x7d6   :  { %806 = vadd.xlane.f32.xlu0 %v805_v56 }
 0x7ec   :  { %815 = vrot.lane.b32.xlu0 %v5328_v53, %s5164_s29 }
 0x7f0   :  { %1385 = vrot.lane.b32.xlu0 %v5326_v51, %s5166_s0 }
 0x7f4   :  { %1546 = vrot.lane.b32.xlu0 %v5328_v53, %s5880_s19 }
 0x7f8   :  { %1624 = vrot.lane.b32.xlu0 %v5326_v51, %s5880_s19 }
 0x7fc   :  { %1544 = vrot.lane.b32.xlu0 %v5328_v53, %s5878_s1 }
 0x863   :  { %v807_v57 = vpop.xlane.xlu0 %806 }
 0x864   :  { %5063 = vrcp.f32 %v807_v57 }
 0x867   :  { %v816_v58 = vpop.permute.xlu0 %815 }
 0x868   :  { %4697 = vmatpush3.msra.mxu1 %v816_v58 }
 0x869   :  { %4706 = vmatprep.subr.mxu1 %v301_v8 }
 0x86b   :  { %v1386_v59 = vpop.permute.xlu0 %1385 }
 0x86c   :  { %4732 = vmatpush3.msra.mxu0 %v1386_v59 }
 0x86d   :  { %4741 = vmatprep.subr.mxu0 %v5157_v48 }
 0x86e   :  { %v5064_v60 = vpop.eup %5063 }
 0x86f   :  { %v813_v61 = vmul.f32 %v5064_v60, %v5062_v55  ;;  %v1547_v30 = vpop.permute.xlu0 %1546 }
 0x871   :  { %4699 = vmatmul.mubr.msk.f32.vlgmr.msra.gmra.mrb[4].mxu1 %vm307_vm4, %v813_v61  ;;  %v963_v62 = vpop.f32.mrb[12].mxu0 }
 0x872   :  { %v4705_v63 = vpop.f32.mrb[13].mxu0  ;;  %4707 = vmatpush3.msra.mxu1 %v301_v8 }
 0x873   :  { %4711 = vmatprep.subr.mxu1 %v300_v9  ;;  %v1625_v32 = vpop.permute.xlu0 %1624 }
 0x875   :  { %v1203_v0 = vpop.f32.mrb[14].mxu0 }
 0x876   :  { %v1285_v1 = vmul.f32 0.35355338, %v1203_v0  ;;  %v4720_v2 = vpop.f32.mrb[15].mxu0 }
 0x877   :  { %v1545_v34 = vpop.permute.xlu0 %1544 }
 0x878   :  { %v1287_v3 = vsel %vm307_vm4, %v1285_v1, -inf }
 0x879   :  { %1288 = vmax.xlane.f32.xlu1 %v1287_v3  ;;  %v1281_v4 = vpop.f32.mrb[16].mxu0 }
 0x87a   :  { %v1286_v5 = vmul.f32 0.35355338, %v1281_v4  ;;  %v4725_v6 = vpop.f32.mrb[17].mxu0  ;;  %v303_v4 = vld [vmem:[%s5863_s8 + $0x18] sm:$0xff] }
 0x87c   :  { %v1290_v7 = vsel %vm307_vm4, %v1286_v5, -inf }
 0x87d   :  { %1291 = vmax.xlane.f32.xlu1 %v1290_v7 }
 0x906   :  { %v1289_v10 = vpop.xlane.xlu1 %1288 }
 0x907   :  { %v1293_v11 = vsub.f32 %v1285_v1, %v1289_v10 }
 0x909   :  { %v1295_v14 = vmul.f32 1.442695, %v1293_v11 }
 0x90a   :  { %v1292_v15 = vpop.xlane.xlu1 %1291 }
 0x90b   :  { %5065 = vpow2.f32 %v1295_v14  ;;  %v1294_v16 = vsub.f32 %v1286_v5, %v1292_v15 }
 0x90d   :  { %v1297_v17 = vmul.f32 1.442695, %v1294_v16 }
 0x90f   :  { %5067 = vpow2.f32 %v1297_v17 }
 0x915   :  { %v5066_v18 = vpop.eup %5065 }
 0x916   :  { %v1299_v19 = vsel %vm307_vm4, %v5066_v18, 0.0 }
 0x917   :  { %1300 = vadd.xlane.f32.xlu1 %v1299_v19 }
 0x919   :  { %v5068_v20 = vpop.eup %5067 }
 0x91a   :  { %v1302_v21 = vsel %vm307_vm4, %v5068_v20, 0.0 }
 0x91b   :  { %1303 = vadd.xlane.f32.xlu1 %v1302_v21 }
 0x92c   :  { %1309 = vrot.lane.b32.xlu1 %v5328_v53, %s5166_s0 }
 0x930   :  { %1622 = vrot.lane.b32.xlu1 %v5326_v51, %s5878_s1 }
 0x944   :  { %v887_v22 = vpop.f32.mrb[4].mxu1 }
 0x945   :  { %v4700_v23 = vpop.f32.mrb[5].mxu1  ;;  %4708 = vmatprep.mubr.msk.f32.mxu1 %vm307_vm4, %v887_v22 }
 0x946   :  { %4709 = vmatmul.mubr.msk.f32.vlgmr.msra.gmra.mrb[6].mxu1 %vm307_vm4, %v963_v62 }
 0x947   :  { %4713 = vmatprep.mubr.msk.f32.mxu1 %vm307_vm4, %v5382_v25  ;;  %4712 = vmatpush3.msra.mxu1 %v300_v9  ;;  %v4425_v9 = vld [vmem:[%s5864_s9] ss:$0 sm:$0xff] }
 0x948   :  { %4726 = vmatprep.subr.mxu1 %v5157_v48 }
 0x94e   :  { %4714 = vmatmul.mubr.msk.f32.vlgmr.msra.gmra.mrb[6].mxu1 %vm307_vm4, %v5384_v28 }
 0x94f   :  { %4728 = vmatprep.mubr.msk.f32.mxu1 %vm5158_vm3, %v5157_v48 }
 0x9a4   :  { %v1301_v24 = vpop.xlane.xlu1 %1300 }
 0x9a5   :  { %5069 = vrcp.f32 %v1301_v24 }
 0x9a8   :  { %v1304_v26 = vpop.xlane.xlu1 %1303 }
 0x9a9   :  { %5071 = vrcp.f32 %v1304_v26 }
 0x9ac   :  { %v1310_v29 = vpop.permute.xlu1 %1309 }
 0x9ad   :  { %4727 = vmatpush3.msra.mxu1 %v1310_v29  ;;  %v2014_v29 = vld [vmem:[%s5867_s12] sm:$0xff] }
 0x9ae   :  { %4736 = vmatprep.subr.mxu1 %v302_v27 }
 0x9af   :  { %v5070_v25 = vpop.eup %5069 }
 0x9b0   :  { %v1307_v31 = vmul.f32 %v5070_v25, %v5066_v18  ;;  %v1623_v39 = vpop.permute.xlu1 %1622 }
 0x9b2   :  { %4729 = vmatmul.mubr.msk.f32.vlgmr.msra.gmra.mrb[8].mxu1 %vm307_vm4, %v1307_v31  ;;  %v2016_v31 = vld [vmem:[%s5867_s12 + $0x10] sm:$0xff] }
 0x9b3   :  { %v5072_v28 = vpop.eup %5071  ;;  %4737 = vmatpush3.msra.mxu1 %v302_v27 }
 0x9b4   :  { %v1308_v33 = vmul.f32 %v5072_v28, %v5068_v20  ;;  %4746 = vmatprep.subr.mxu1 %v5157_v48  ;;  %v2017_v28 = vld [vmem:[%s5867_s12 + $0x18] sm:$0xff] }
 0x9b6   :  { %4734 = vmatmul.mubr.msk.f32.vlgmr.msra.gmra.mrb[18].mxu0 %vm307_vm4, %v1308_v33 }
 0x9b7   :  { %4742 = vmatpush3.xpose.msk.msra.mxu0 %vm307_vm4, %v1547_v30  ;;  %4743 = vmatprep.mubr.msk.f32.mxu0 %vm5158_vm3, %v5157_v48  ;;  %v2015_v30 = vld [vmem:[%s5867_s12 + $0x8] sm:$0xff] }
 0x9b8   :  { %4751 = vmatprep.subr.mxu0 %v5157_v48  ;;  %v4956_v25 = vpack.c.bf16 %v2015_v30, %v2014_v29 }
 0x9ba   :  { %4744 = vmatmul.mubr.msk.f32.vlgmr.msra.gmra.mrb[20].mxu0 %vm307_vm4, %v1545_v34 }
 0x9bb   :  { %4753 = vmatprep.mubr.msk.f32.mxu0 %vm5158_vm3, %v5157_v48 }
 0xa85   :  { %v1381_v35 = vpop.f32.mrb[8].mxu1 }
 0xa86   :  { %v4730_v36 = vpop.f32.mrb[9].mxu1  ;;  %4738 = vmatprep.mubr.msk.f32.mxu1 %vm307_vm4, %v1381_v35 }
 0xa89   :  { %v1457_v37 = vpop.f32.mrb[18].mxu0 }
 0xa8a   :  { %v4735_v38 = vpop.f32.mrb[19].mxu0  ;;  %4739 = vmatmul.mubr.msk.f32.vlgmr.msra.gmra.mrb[6].mxu1 %vm307_vm4, %v1457_v37 }
 0xa8b   :  { %4747 = vmatpush3.xpose.msk.msra.mxu1 %vm307_vm4, %v1625_v32  ;;  %4748 = vmatprep.mubr.msk.f32.mxu1 %vm5158_vm3, %v5157_v48  ;;  %v4960_v32 = vpack.c.bf16 %v2017_v28, %v2016_v31 }
 0xa8c   :  { %4756 = vmatprep.subr.mxu1 %v5157_v48 }
 0xa8d   :  { %v1618_v40 = vpop.f32.mrb[20].mxu0 }
 0xa8e   :  { %v1700_v41 = vmul.f32 0.35355338, %v1618_v40  ;;  %v4745_v42 = vpop.f32.mrb[21].mxu0  ;;  %4749 = vmatmul.mubr.msk.f32.vlgmr.msra.gmra.mrb[10].mxu1 %vm307_vm4, %v1623_v39  ;;  %v4426_v40 = vld [vmem:[%s5865_s10] ss:$0 sm:$0xff] }
 0xa8f   :  { %4758 = vmatprep.mubr.msk.f32.mxu1 %vm5158_vm3, %v5157_v48 }
 0xa90   :  { %v1702_v43 = vsel %vm307_vm4, %v1700_v41, -inf }
 0xa91   :  { %1703 = vmax.xlane.f32.xlu0 %v1702_v43 }
 0xb1e   :  { %v1704_v44 = vpop.xlane.xlu0 %1703 }
 0xb1f   :  { %v1708_v45 = vsub.f32 %v1700_v41, %v1704_v44  ;;  %v4427_v44 = vld [vmem:[%s5866_s11] ss:$0 sm:$0xff] }
 0xb21   :  { %v1710_v46 = vmul.f32 1.442695, %v1708_v45 }
 0xb23   :  { %5073 = vpow2.f32 %v1710_v46 }
 0xb2d   :  { %v5074_v47 = vpop.eup %5073 }
 0xb2e   :  { %v1714_v49 = vsel %vm307_vm4, %v5074_v47, 0.0 }
 0xb2f   :  { %1715 = vadd.xlane.f32.xlu0 %v1714_v49 }
 0xb61   :  { %v1696_v50 = vpop.f32.mrb[10].mxu1 }
 0xb62   :  { %v1701_v52 = vmul.f32 0.35355338, %v1696_v50  ;;  %v4750_v54 = vpop.f32.mrb[11].mxu1  ;;  %v2116_v50 = vld [vmem:[%s5869_s14] sm:$0xff] }
 0xb64   :  { %v1705_v55 = vsel %vm307_vm4, %v1701_v52, -inf }
 0xb65   :  { %1706 = vmax.xlane.f32.xlu1 %v1705_v55  ;;  %v2118_v55 = vld [vmem:[%s5869_s14 + $0x10] sm:$0xff] }
 0xb76   :  { %1800 = vrot.lane.b32.xlu1 %v5326_v51, %s5876_s20 }
 0xbbc   :  { %v1716_v62 = vpop.xlane.xlu0 %1715 }
 0xbf2   :  { %v1707_v56 = vpop.xlane.xlu1 %1706 }
 0xbf3   :  { %v1709_v57 = vsub.f32 %v1701_v52, %v1707_v56  ;;  %v2117_v52 = vld [vmem:[%s5869_s14 + $0x8] sm:$0xff]  ;;  %v2119_v56 = vld [vmem:[%s5869_s14 + $0x18] sm:$0xff] }
 0xbf4   :  { %v4964_v54 = vpack.c.bf16 %v2117_v52, %v2116_v50  ;;  %v4437_v50 = vld [vmem:[%s5860_s5 + $0x1] ss:$0 sm:$0xff]  ;;  %s5888_s5 = smov 72  }
 0xbf5   :  { %v1712_v58 = vmul.f32 1.442695, %v1709_v57  ;;  %v4968_v57 = vpack.c.bf16 %v2119_v56, %v2118_v55 }
 0xbf6   :  { %v1801_v59 = vpop.permute.xlu1 %1800 }
 0xbf7   :  { %5075 = vpow2.f32 %v1712_v58  ;;  %4757 = vmatpush3.msra.mxu1 %v1801_v59  ;;  %v2120_v58 = vld [vmem:[%s5869_s14 + $0x20] sm:$0xff]  ;;  %v2121_v59 = vld [vmem:[%s5869_s14 + $0x28] sm:$0xff] }
 0xbf8   :  { %5077 = vrcp.f32 %v1716_v62  ;;  %4761 = vmatprep.subr.mxu1 %v303_v4  ;;  %v2123_v62 = vld [vmem:[%s5869_s14 + $0x38] sm:$0xff] }
 0xc01   :  { %v5076_v60 = vpop.eup %5075 }
 0xc02   :  { %v1717_v61 = vsel %vm307_vm4, %v5076_v60, 0.0  ;;  %v5078_v0 = vpop.eup %5077 }
 0xc03   :  { %1718 = vadd.xlane.f32.xlu0 %v1717_v61  ;;  %v1722_v1 = vmul.f32 %v5078_v0, %v5074_v47  ;;  %v2122_v61 = vld [vmem:[%s5869_s14 + $0x30] sm:$0xff]  ;;  %v4428_v0 = vld [vmem:[%s5868_s13] ss:$0 sm:$0xff] }
 0xc19   :  { %1724 = vrot.lane.b32.xlu0 %v5328_v53, %s5876_s20 }
 0xc90   :  { %v1719_v63 = vpop.xlane.xlu0 %1718 }
 0xc91   :  { %5079 = vrcp.f32 %v1719_v63  ;;  %v4976_v63 = vpack.c.bf16 %v2123_v62, %v2122_v61 }
 0xc94   :  { %v1725_v51 = vpop.permute.xlu0 %1724 }
 0xc95   :  { %4752 = vmatpush3.msra.mxu0 %v1725_v51 }
 0xc96   :  { %4754 = vmatmul.mubr.msk.f32.vlgmr.msra.gmra.mrb[22].mxu0 %vm307_vm4, %v1722_v1  ;;  %4957 = vmatprep.subr.bf16.mxu0 %v4956_v25 }
 0xc97   :  { %4959 = vmatpush3.bf16.msra.mxu0 %v4956_v25 }
 0xc98   :  { %4961 = vmatprep.subr.bf16.mxu0 %v4960_v32 }
 0xc9b   :  { %v5080_v2 = vpop.eup %5079  ;;  %4963 = vmatpush3.bf16.msra.mxu0 %v4960_v32  ;;  %v4438_v32 = vld [vmem:[%s5861_s6 + $0x20] sm:$0xff] }
 0xc9c   :  { %v1723_v3 = vmul.f32 %v5080_v2, %v5076_v60  ;;  %v4972_v60 = vpack.c.bf16 %v2121_v59, %v2120_v58 }
 0xc9e   :  { %4759 = vmatmul.mubr.msk.f32.vlgmr.msra.gmra.mrb[12].mxu1 %vm307_vm4, %v1723_v3 }
 0xc9f   :  { %4762 = vmatpush3.msra.mxu1 %v303_v4 }
 0xca0   :  { %4965 = vmatprep.subr.bf16.mxu1 %v4964_v54 }
 0xd69   :  { %v1796_v53 = vpop.f32.mrb[22].mxu0 }
 0xd6a   :  { %v4755_v5 = vpop.f32.mrb[23].mxu0  ;;  %4763 = vmatprep.mubr.msk.f32.mxu1 %vm307_vm4, %v1796_v53 }
 0xd71   :  { %v1872_v6 = vpop.f32.mrb[12].mxu1 }
 0xd72   :  { %v4760_v7 = vpop.f32.mrb[13].mxu1  ;;  %4764 = vmatmul.mubr.msk.f32.vlgmr.msra.gmra.mrb[6].mxu1 %vm307_vm4, %v1872_v6 }
 0xd73   :  { %4967 = vmatpush3.bf16.msra.mxu1 %v4964_v54 }
 0xd74   :  { %4969 = vmatprep.subr.bf16.mxu1 %v4968_v57 }
 0xd77   :  { %4971 = vmatpush3.bf16.msra.mxu1 %v4968_v57  ;;  %v4443_v57 = vld [vmem:[%s5862_s7 + $0x1] ss:$0 sm:$0xff]  ;;  %s5889_s7 = smov 104  }
 0xd78   :  { %4973 = vmatprep.subr.bf16.mxu1 %v4972_v60 }
 0xd7b   :  { %4975 = vmatpush3.bf16.msra.mxu1 %v4972_v60 }
 0xd7c   :  { %4977 = vmatprep.subr.bf16.mxu1 %v4976_v63 }
 0xd7f   :  { %4979 = vmatpush3.bf16.msra.mxu1 %v4976_v63 }
 0xd80   :  { %4817 = vmatprep.subr.mxu1 %v5157_v48 }
 0xe45   :  { %v4765_v8 = vpop.f32.mrb[6].mxu1 }
 0xe46   :  { %v1960_v10 = vadd.f32 %v4765_v8, %v5287_v13  ;;  %v1948_v11 = vpop.f32.mrb[7].mxu1 }
 0xe47   :  { %v1959_v14 = vadd.f32 %v1948_v11, %v5285_v12 }
 0xe48   :  { %v5489_v15 = vadd.f32 %v4425_v9, %v1960_v10 }
 0xe49   :  { %v5491_v16 = vadd.f32 %v4425_v9, %v1959_v14 }
 0xe4a   :  { %v1975_v17 = vsel %vm164_vm2, %v5489_v15, 0.0 }
 0xe4b   :  { %1976 = vadd.xlane.f32.xlu0 %v1975_v17  ;;  %v1972_v18 = vsel %vm164_vm2, %v5491_v16, 0.0  ;;  %v4431_v17 = vld [vmem:[%s5870_s15] ss:$0 sm:$0xff] }
 0xe4c   :  { %1973 = vadd.xlane.f32.xlu1 %v1972_v18 }
 0xed8   :  { %v1977_v19 = vpop.xlane.xlu0 %1976 }
 0xed9   :  { %v1979_v20 = vmul.f32 0.03125, %v1977_v19  ;;  %v1974_v21 = vpop.xlane.xlu1 %1973 }
 0xeda   :  { %v1978_v22 = vmul.f32 0.03125, %v1974_v21 }
 0xedb   :  { %v1981_v13 = vsub.f32 %v5489_v15, %v1979_v20 }
 0xedc   :  { %v1980_v12 = vsub.f32 %v5491_v16, %v1978_v22 }
 0xedd   :  { %v1983_v23 = vmul.f32 %v1981_v13, %v1981_v13 }
 0xede   :  { %v1982_v24 = vmul.f32 %v1980_v12, %v1980_v12 }
 0xedf   :  { %v1987_v26 = vsel %vm164_vm2, %v1983_v23, 0.0 }
 0xee0   :  { %1988 = vadd.xlane.f32.xlu1 %v1987_v26  ;;  %v1984_v27 = vsel %vm164_vm2, %v1982_v24, 0.0 }
 0xee1   :  { %1985 = vadd.xlane.f32.xlu0 %v1984_v27 }
 0xf6d   :  { %v1989_v33 = vpop.xlane.xlu1 %1988 }
 0xf6e   :  { %v1991_v34 = vmul.f32 0.03125, %v1989_v33  ;;  %v1986_v35 = vpop.xlane.xlu0 %1985  ;;  %v4439_v33 = vld [vmem:[%s5861_s6 + $0x28] sm:$0xff] }
 0xf6f   :  { %v1990_v36 = vmul.f32 0.03125, %v1986_v35  ;;  %v4440_v35 = vld [vmem:[%s5861_s6 + $0x30] sm:$0xff] }
 0xf70   :  { %v1993_v37 = vadd.f32 1e-05, %v1991_v34  ;;  %v4980_v34 = vpack.c.bf16 %v4439_v33, %v4438_v32 }
 0xf71   :  { %v1992_v38 = vadd.f32 1e-05, %v1990_v36  ;;  %v4441_v36 = vld [vmem:[%s5861_s6 + $0x38] sm:$0xff] }
 0xf72   :  { %5081 = vrsqrt.f32 %v1993_v37  ;;  %4981 = vmatprep.subr.bf16.mxu0 %v4980_v34  ;;  %v4984_v37 = vpack.c.bf16 %v4441_v36, %v4440_v35 }
 0xf73   :  { %5083 = vrsqrt.f32 %v1992_v38 }
 0xf7c   :  { %v5082_v39 = vpop.eup %5081 }
 0xf7d   :  { %v5084_v41 = vpop.eup %5083  ;;  %v1997_v42 = vmul.f32 %v5082_v39, %v1981_v13 }
 0xf7e   :  { %v1996_v43 = vmul.f32 %v5084_v41, %v1980_v12 }
 0xf7f   :  { %v2005_v45 = vmul.f32 %v4426_v40, %v1997_v42 }
 0xf80   :  { %v2004_v46 = vmul.f32 %v4426_v40, %v1996_v43 }
 0xf81   :  { %v2013_v49 = vadd.f32 %v4427_v44, %v2005_v45  ;;  %v4436_v45 = vld [vmem:[%s5859_s4 + $0x1] ss:$0 sm:$0xff] }
 0xf82   :  { %v2012_v47 = vadd.f32 %v4427_v44, %v2004_v46 }
 0xf84   :  { %4774 = vmatprep.mubr.msk.f32.mxu0 %vm164_vm2, %v2012_v47 }
 0xf85   :  { %4775 = vmatmul.mubr.msk.f32.vlgmr.msra.gmra.mrb[24].mxu0 %vm164_vm2, %v2013_v49 }
 0xf86   :  { %4983 = vmatpush3.bf16.msra.mxu0 %v4980_v34 }
 0xf87   :  { %4985 = vmatprep.subr.bf16.mxu0 %v4984_v37 }
 0xf8a   :  { %4987 = vmatpush3.bf16.msra.mxu0 %v4984_v37 }
 0xf8b   :  { %4807 = vmatprep.subr.mxu0 %v5157_v48 }
0x1058   :  { %v4776_v1 = vpop.f32.mrb[24].mxu0 }
0x1059   :  { %v2103_v51 = vadd.f32 %v4776_v1, %v4428_v0  ;;  %v2097_v2 = vpop.f32.mrb[25].mxu0 }
0x105a   :  { %v2098_v3 = vadd.f32 %v4428_v0, %v2097_v2 }
0x105b   :  { %v2109_v4 = vmul.f32 0.70710677, %v2103_v51  ;;  %v2107_v10 = vmul.f32 0.5, %v2103_v51 }
0x105c   :  { %v2108_v53 = vmul.f32 0.70710677, %v2098_v3  ;;  %v2106_v8 = vmul.f32 0.5, %v2098_v3 }
0x105d   :  { %5085 = verf.f32 %v2109_v4 }
0x105e   :  { %5087 = verf.f32 %v2108_v53 }
0x1067   :  { %v5086_v5 = vpop.eup %5085 }
0x1068   :  { %v5088_v6 = vpop.eup %5087  ;;  %v2113_v7 = vadd.f32 1.0, %v5086_v5 }
0x1069   :  { %v2112_v9 = vadd.f32 1.0, %v5088_v6 }
0x106a   :  { %v2115_v14 = vmul.f32 %v2113_v7, %v2107_v10 }
0x106b   :  { %v2114_v11 = vmul.f32 %v2112_v9, %v2106_v8 }
0x106d   :  { %4793 = vmatprep.mubr.msk.f32.mxu1 %vm2131_vm5, %v2114_v11 }
0x106e   :  { %4794 = vmatmul.mubr.msk.f32.vlgmr.msra.gmra.mrb[14].mxu1 %vm2131_vm5, %v2115_v14 }
0x106f   :  { %4819 = vmatprep.mubr.msk.f32.mxu1 %vm5158_vm3, %v5157_v48 }
0x1141   :  { %v4795_v18 = vpop.f32.mrb[14].mxu1 }
0x1142   :  { %v2210_v19 = vadd.f32 %v4795_v18, %v4431_v17  ;;  %v2204_v20 = vpop.f32.mrb[15].mxu1 }
0x1143   :  { %v2205_v21 = vadd.f32 %v4431_v17, %v2204_v20 }
0x1144   :  { %v5557_v22 = vadd.f32 %v2210_v19, %v5489_v15 }
0x1145   :  { %v5560_v13 = vadd.f32 %v2205_v21, %v5491_v16 }
0x1146   :  { %v2222_v12 = vsel %vm164_vm2, %v5557_v22, 0.0 }
0x1147   :  { %2223 = vadd.xlane.f32.xlu1 %v2222_v12  ;;  %v2219_v23 = vsel %vm164_vm2, %v5560_v13, 0.0 }
0x1148   :  { %2220 = vadd.xlane.f32.xlu0 %v2219_v23 }
0x11d4   :  { %v2224_v24 = vpop.xlane.xlu1 %2223 }
0x11d5   :  { %v2226_v26 = vmul.f32 0.03125, %v2224_v24  ;;  %v2221_v27 = vpop.xlane.xlu0 %2220 }
0x11d6   :  { %v2225_v29 = vmul.f32 0.03125, %v2221_v27 }
0x11d7   :  { %v2228_v30 = vsub.f32 %v5557_v22, %v2226_v26 }
0x11d8   :  { %v2227_v15 = vsub.f32 %v5560_v13, %v2225_v29 }
0x11d9   :  { %v2230_v25 = vmul.f32 %v2228_v30, %v2228_v30 }
0x11da   :  { %v2229_v31 = vmul.f32 %v2227_v15, %v2227_v15 }
0x11db   :  { %v2234_v16 = vsel %vm164_vm2, %v2230_v25, 0.0 }
0x11dc   :  { %2235 = vadd.xlane.f32.xlu1 %v2234_v16  ;;  %v2231_v28 = vsel %vm164_vm2, %v2229_v31, 0.0 }
0x11dd   :  { %2232 = vadd.xlane.f32.xlu0 %v2231_v28 }
0x1269   :  { %v2236_v38 = vpop.xlane.xlu1 %2235 }
0x126a   :  { %v2238_v39 = vmul.f32 0.03125, %v2236_v38  ;;  %v2233_v40 = vpop.xlane.xlu0 %2232 }
0x126b   :  { %v2237_v41 = vmul.f32 0.03125, %v2233_v40 }
0x126c   :  { %v2240_v42 = vadd.f32 1e-05, %v2238_v39 }
0x126d   :  { %v2239_v43 = vadd.f32 1e-05, %v2237_v41 }
0x126e   :  { %5089 = vrsqrt.f32 %v2240_v42 }
0x126f   :  { %5091 = vrsqrt.f32 %v2239_v43 }
0x1278   :  { %v5090_v44 = vpop.eup %5089 }
0x1279   :  { %v5092_v46 = vpop.eup %5091  ;;  %v2244_v47 = vmul.f32 %v5090_v44, %v2228_v30 }
0x127a   :  { %v2243_v49 = vmul.f32 %v5092_v46, %v2227_v15 }
0x127b   :  { %v2252_v52 = vmul.f32 %v4436_v45, %v2244_v47 }
0x127c   :  { %v2251_v54 = vmul.f32 %v4436_v45, %v2243_v49 }
0x127d   :  { %v2260_v56 = vadd.f32 %v4437_v50, %v2252_v52 }
0x127e   :  { %v2259_v55 = vadd.f32 %v4437_v50, %v2251_v54 }
0x1280   :  { %4804 = vmatprep.mubr.msk.f32.mxu0 %vm164_vm2, %v2259_v55 }
0x1281   :  { %4805 = vmatmul.mubr.msk.f32.vlgmr.msra.gmra.mrb[26].mxu0 %vm164_vm2, %v2260_v56 }
0x1282   :  { %4809 = vmatprep.mubr.msk.f32.mxu0 %vm5158_vm3, %v5157_v48 }
0x1354   :  { %v4806_v58 = vpop.f32.mrb[26].mxu0 }
0x1355   :  { %v5596_v59 = vadd.f32 %v4806_v58, %v4443_v57  ;;  %v2346_v60 = vpop.f32.mrb[27].mxu0 }
0x1356   :  { %v5598_v61 = vadd.f32 %v4443_v57, %v2346_v60 }
0x1357   :  { %2438 = vrot.lane.b32.xlu1 %v5596_v59, %s5159_s25 }
0x1358   :  { %2361 = vrot.lane.b32.xlu0 %v5598_v61, %s5159_s25 }
0x13c9   :  { %v2439_v63 = vpop.permute.xlu1 %2438 }
0x13ca   :  { %v2362_v62 = vpop.permute.xlu0 %2361 }
0x13cb   :  { %4808 = vmatpush3.xpose.msk.msra.mxu0 %vm307_vm4, %v2362_v62 }
0x13cc   :  { %4812 = vmatprep.subr.mxu0 %v5157_v48 }
0x13ce   :  { %4810 = vmatmul.mubr.msk.f32.vlgmr.msra.gmra.mrb[28].mxu0 %vm307_vm4, %v5598_v61 }
0x13cf   :  { %4813 = vmatpush3.xpose.msk.msra.mxu0 %vm307_vm4, %v2439_v63  ;;  %4814 = vmatprep.mubr.msk.f32.mxu0 %vm5158_vm3, %v5157_v48 }
0x13d0   :  { %4822 = vmatprep.subr.mxu0 %v5157_v48 }
0x13d2   :  { %4815 = vmatmul.mubr.msk.f32.vlgmr.msra.gmra.mrb[30].mxu0 %vm307_vm4, %v5596_v59 }
0x13d3   :  { %4824 = vmatprep.mubr.msk.f32.mxu0 %vm5158_vm3, %v5157_v48 }
0x14a1   :  { %v2433_v0 = vpop.f32.mrb[28].mxu0 }
0x14a2   :  { %v4811_v1 = vpop.f32.mrb[29].mxu0  ;;  %v2514_v53 = vmul.f32 0.35355338, %v2433_v0 }
0x14a4   :  { %v2516_v5 = vsel %vm307_vm4, %v2514_v53, -inf }
0x14a5   :  { %v2510_v51 = vpop.f32.mrb[30].mxu0 }
0x14a6   :  { %v2515_v2 = vmul.f32 0.35355338, %v2510_v51  ;;  %v4816_v3 = vpop.f32.mrb[31].mxu0 }
0x14a8   :  { %v2519_v4 = vsel %vm307_vm4, %v2515_v2, -inf }
0x14a9   :  { %2520 = vmax.xlane.f32.xlu1 %v2519_v4 }
0x14ba   :  { %2770 = vrot.lane.b32.xlu1 %v5596_v59, %s5161_s3 }
0x14be   :  { %2768 = vrot.lane.b32.xlu1 %v5596_v59, %s5162_s27 }
0x14e2   :  { %2517 = vmax.xlane.f32.xlu1 %v2516_v5 }
0x14f3   :  { %2692 = vrot.lane.b32.xlu1 %v5598_v61, %s5161_s3 }
0x14f7   :  { %2690 = vrot.lane.b32.xlu1 %v5598_v61, %s5162_s27 }
0x14fb   :  { %3186 = vrot.lane.b32.xlu1 %v5598_v61, %s5163_s28 }
0x1536   :  { %v2521_v6 = vpop.xlane.xlu1 %2520 }
0x1537   :  { %v2523_v7 = vsub.f32 %v2515_v2, %v2521_v6 }
0x1539   :  { %v2526_v8 = vmul.f32 1.442695, %v2523_v7 }
0x153a   :  { %v2771_v11 = vpop.permute.xlu1 %2770 }
0x153b   :  { %5093 = vpow2.f32 %v2526_v8 }
0x153e   :  { %v2769_v14 = vpop.permute.xlu1 %2768 }
0x1545   :  { %v5094_v9 = vpop.eup %5093 }
0x1546   :  { %v2531_v10 = vsel %vm307_vm4, %v5094_v9, 0.0 }
0x1547   :  { %2532 = vadd.xlane.f32.xlu0 %v2531_v10 }
0x155d   :  { %2614 = vrot.lane.b32.xlu0 %v5596_v59, %s5160_s26 }
0x156f   :  { %v2518_v17 = vpop.xlane.xlu1 %2517 }
0x1570   :  { %v2522_v18 = vsub.f32 %v2514_v53, %v2518_v17 }
0x1572   :  { %v2524_v19 = vmul.f32 1.442695, %v2522_v18  ;;  %v4447_v18 = vld [vmem:[%s5863_s8 + $0x28] sm:$0xff] }
0x1573   :  { %v2693_v15 = vpop.permute.xlu1 %2692 }
0x1574   :  { %5095 = vpow2.f32 %v2524_v19  ;;  %v4446_v19 = vld [vmem:[%s5863_s8 + $0x20] sm:$0xff] }
0x1577   :  { %v2691_v31 = vpop.permute.xlu1 %2690 }
0x157b   :  { %v3187_v49 = vpop.permute.xlu1 %3186 }
0x157e   :  { %v5096_v20 = vpop.eup %5095 }
0x157f   :  { %v2528_v21 = vsel %vm307_vm4, %v5096_v20, 0.0 }
0x1580   :  { %2529 = vadd.xlane.f32.xlu0 %v2528_v21 }
0x1596   :  { %2538 = vrot.lane.b32.xlu0 %v5598_v61, %s5160_s26  ;;  %s5171_s26 = smov [#allocation2]  }
0x15d4   :  { %v2533_v12 = vpop.xlane.xlu0 %2532 }
0x15d5   :  { %5097 = vrcp.f32 %v2533_v12 }
0x15d8   :  { %v2615_v23 = vpop.permute.xlu0 %2614 }
0x15d9   :  { %4823 = vmatpush3.msra.mxu0 %v2615_v23 }
0x15da   :  { %4832 = vmatprep.subr.mxu0 %v5157_v48 }
0x15df   :  { %v5098_v24 = vpop.eup %5097 }
0x15e0   :  { %v2537_v26 = vmul.f32 %v5098_v24, %v5094_v9 }
0x15e2   :  { %4825 = vmatmul.mubr.msk.f32.vlgmr.msra.gmra.mrb[32].mxu0 %vm307_vm4, %v2537_v26 }
0x15e3   :  { %4833 = vmatpush3.xpose.msk.msra.mxu0 %vm307_vm4, %v2771_v11  ;;  %4834 = vmatprep.mubr.msk.f32.mxu0 %vm5158_vm3, %v5157_v48 }
0x15e4   :  { %4842 = vmatprep.subr.mxu0 %v5157_v48 }
0x15e6   :  { %4835 = vmatmul.mubr.msk.f32.vlgmr.msra.gmra.mrb[34].mxu0 %vm307_vm4, %v2769_v14 }
0x15e7   :  { %4844 = vmatprep.mubr.msk.f32.mxu0 %vm5158_vm3, %v5157_v48 }
0x160d   :  { %v2530_v27 = vpop.xlane.xlu0 %2529 }
0x160e   :  { %5099 = vrcp.f32 %v2530_v27 }
0x1611   :  { %v2539_v29 = vpop.permute.xlu0 %2538 }
0x1612   :  { %4818 = vmatpush3.msra.mxu1 %v2539_v29 }
0x1613   :  { %4827 = vmatprep.subr.mxu1 %v5157_v48 }
0x1618   :  { %v5100_v30 = vpop.eup %5099 }
0x1619   :  { %v2536_v25 = vmul.f32 %v5100_v30, %v5096_v20 }
0x161b   :  { %4820 = vmatmul.mubr.msk.f32.vlgmr.msra.gmra.mrb[16].mxu1 %vm307_vm4, %v2536_v25 }
0x161c   :  { %4828 = vmatpush3.xpose.msk.msra.mxu1 %vm307_vm4, %v2693_v15  ;;  %4829 = vmatprep.mubr.msk.f32.mxu1 %vm5158_vm3, %v5157_v48 }
0x161d   :  { %4837 = vmatprep.subr.mxu1 %v5157_v48 }
0x161f   :  { %4830 = vmatmul.mubr.msk.f32.vlgmr.msra.gmra.mrb[18].mxu1 %vm307_vm4, %v2691_v31 }
0x1620   :  { %4839 = vmatprep.mubr.msk.f32.mxu1 %vm5158_vm3, %v5157_v48 }
0x16b5   :  { %v5652_v16 = vpop.f32.mrb[32].mxu0 }
0x16b6   :  { %v4826_v28 = vpop.f32.mrb[33].mxu0 }
0x16b9   :  { %v2842_v32 = vpop.f32.mrb[34].mxu0 }
0x16ba   :  { %v2847_v33 = vmul.f32 0.35355338, %v2842_v32  ;;  %v4836_v34 = vpop.f32.mrb[35].mxu0 }
0x16bc   :  { %v2851_v35 = vsel %vm307_vm4, %v2847_v33, -inf }
0x16bd   :  { %2852 = vmax.xlane.f32.xlu0 %v2851_v35 }
0x16d3   :  { %2946 = vrot.lane.b32.xlu0 %v5596_v59, %s5164_s29 }
0x16d7   :  { %3184 = vrot.lane.b32.xlu0 %v5598_v61, %s5165_s30 }
0x16db   :  { %3262 = vrot.lane.b32.xlu0 %v5596_v59, %s5165_s30  ;;  %s5890_s30 = smov 40  }
0x16ee   :  { %v5661_v36 = vpop.f32.mrb[16].mxu1 }
0x16ef   :  { %v4821_v37 = vpop.f32.mrb[17].mxu1 }
0x16f2   :  { %v2764_v38 = vpop.f32.mrb[18].mxu1 }
0x16f3   :  { %v4831_v39 = vpop.f32.mrb[19].mxu1  ;;  %v2846_v46 = vmul.f32 0.35355338, %v2764_v38 }
0x16f5   :  { %v2848_v47 = vsel %vm307_vm4, %v2846_v46, -inf }
0x174a   :  { %v2853_v40 = vpop.xlane.xlu0 %2852 }
0x174b   :  { %v2855_v41 = vsub.f32 %v2847_v33, %v2853_v40  ;;  %v4448_v33 = vld [vmem:[%s5863_s8 + $0x30] sm:$0xff] }
0x174d   :  { %v2858_v42 = vmul.f32 1.442695, %v2855_v41 }
0x174e   :  { %v2947_v43 = vpop.permute.xlu0 %2946 }
0x174f   :  { %5101 = vpow2.f32 %v2858_v42  ;;  %4843 = vmatpush3.msra.mxu0 %v2947_v43 }
0x1750   :  { %4857 = vmatprep.subr.mxu0 %v5157_v48 }
0x1752   :  { %v3185_v55 = vpop.permute.xlu0 %3184 }
0x1756   :  { %v3263_v57 = vpop.permute.xlu0 %3262 }
0x1759   :  { %v5102_v44 = vpop.eup %5101 }
0x175a   :  { %v2863_v45 = vsel %vm307_vm4, %v5102_v44, 0.0 }
0x175b   :  { %2864 = vadd.xlane.f32.xlu1 %v2863_v45 }
0x176c   :  { %3264 = vrot.lane.b32.xlu1 %v5596_v59, %s5163_s28 }
0x1790   :  { %2849 = vmax.xlane.f32.xlu1 %v2848_v47 }
0x17e8   :  { %v2865_v50 = vpop.xlane.xlu1 %2864 }
0x17e9   :  { %5103 = vrcp.f32 %v2865_v50 }
0x17ec   :  { %v3265_v56 = vpop.permute.xlu1 %3264 }
0x17f3   :  { %v5104_v52 = vpop.eup %5103 }
0x17f4   :  { %v2869_v54 = vmul.f32 %v5104_v52, %v5102_v44 }
0x17f6   :  { %4845 = vmatmul.mubr.msk.f32.vlgmr.msra.gmra.mrb[36].mxu0 %vm307_vm4, %v2869_v54 }
0x17f7   :  { %4858 = vmatpush3.xpose.msk.msra.mxu0 %vm307_vm4, %v3187_v49  ;;  %4859 = vmatprep.mubr.msk.f32.mxu0 %vm5158_vm3, %v5157_v48 }
0x17f8   :  { %4862 = vmatprep.subr.mxu0 %v5157_v48 }
0x17fa   :  { %4860 = vmatmul.mubr.msk.f32.vlgmr.msra.gmra.mrb[38].mxu0 %vm307_vm4, %v3185_v55 }
0x17fb   :  { %4863 = vmatpush3.xpose.msk.msra.mxu0 %vm307_vm4, %v3265_v56  ;;  %4864 = vmatprep.mubr.msk.f32.mxu0 %vm5158_vm3, %v5157_v48 }
0x17fc   :  { %4872 = vmatprep.subr.mxu0 %v5157_v48 }
0x17fe   :  { %4865 = vmatmul.mubr.msk.f32.vlgmr.msra.gmra.mrb[40].mxu0 %vm307_vm4, %v3263_v57 }
0x17ff   :  { %4874 = vmatprep.mubr.msk.f32.mxu0 %vm5158_vm3, %v5157_v48 }
0x181d   :  { %v2850_v58 = vpop.xlane.xlu1 %2849 }
0x181e   :  { %v2854_v60 = vsub.f32 %v2846_v46, %v2850_v58 }
0x1820   :  { %v2856_v62 = vmul.f32 1.442695, %v2854_v60 }
0x1822   :  { %5105 = vpow2.f32 %v2856_v62 }
0x182c   :  { %v5106_v63 = vpop.eup %5105 }
0x182d   :  { %v2860_v0 = vsel %vm307_vm4, %v5106_v63, 0.0 }
0x182e   :  { %2861 = vadd.xlane.f32.xlu0 %v2860_v0 }
0x1844   :  { %2870 = vrot.lane.b32.xlu0 %v5598_v61, %s5164_s29 }
0x1848   :  { %3440 = vrot.lane.b32.xlu0 %v5596_v59, %s5166_s0 }
0x184c   :  { %3601 = vrot.lane.b32.xlu0 %v5598_v61, %s5888_s5 }
0x1850   :  { %3679 = vrot.lane.b32.xlu0 %v5596_v59, %s5888_s5 }
0x1854   :  { %3599 = vrot.lane.b32.xlu0 %v5598_v61, %s5889_s7 }
0x18bb   :  { %v2862_v1 = vpop.xlane.xlu0 %2861 }
0x18bc   :  { %5107 = vrcp.f32 %v2862_v1 }
0x18bf   :  { %v2871_v51 = vpop.permute.xlu0 %2870 }
0x18c0   :  { %4838 = vmatpush3.msra.mxu1 %v2871_v51 }
0x18c1   :  { %4847 = vmatprep.subr.mxu1 %v4447_v18 }
0x18c3   :  { %v3441_v2 = vpop.permute.xlu0 %3440 }
0x18c4   :  { %4873 = vmatpush3.msra.mxu0 %v3441_v2 }
0x18c5   :  { %4882 = vmatprep.subr.mxu0 %v5157_v48 }
0x18c6   :  { %v5108_v3 = vpop.eup %5107 }
0x18c7   :  { %v2868_v4 = vmul.f32 %v5108_v3, %v5106_v63  ;;  %v3602_v35 = vpop.permute.xlu0 %3601 }
0x18c9   :  { %4840 = vmatmul.mubr.msk.f32.vlgmr.msra.gmra.mrb[20].mxu1 %vm307_vm4, %v2868_v4  ;;  %v3018_v53 = vpop.f32.mrb[36].mxu0 }
0x18ca   :  { %v4846_v5 = vpop.f32.mrb[37].mxu0  ;;  %4848 = vmatpush3.msra.mxu1 %v4447_v18 }
0x18cb   :  { %4852 = vmatprep.subr.mxu1 %v4446_v19  ;;  %v3680_v38 = vpop.permute.xlu0 %3679 }
0x18cd   :  { %v3258_v6 = vpop.f32.mrb[38].mxu0 }
0x18ce   :  { %v3340_v7 = vmul.f32 0.35355338, %v3258_v6  ;;  %v4861_v8 = vpop.f32.mrb[39].mxu0 }
0x18cf   :  { %v3600_v40 = vpop.permute.xlu0 %3599 }
0x18d0   :  { %v3342_v9 = vsel %vm307_vm4, %v3340_v7, -inf }
0x18d1   :  { %3343 = vmax.xlane.f32.xlu1 %v3342_v9  ;;  %v3336_v10 = vpop.f32.mrb[40].mxu0 }
0x18d2   :  { %v3341_v11 = vmul.f32 0.35355338, %v3336_v10  ;;  %v4866_v14 = vpop.f32.mrb[41].mxu0  ;;  %v4449_v10 = vld [vmem:[%s5863_s8 + $0x38] sm:$0xff] }
0x18d4   :  { %v3345_v17 = vsel %vm307_vm4, %v3341_v11, -inf }
0x18d5   :  { %3346 = vmax.xlane.f32.xlu1 %v3345_v17 }
0x195e   :  { %v3344_v20 = vpop.xlane.xlu1 %3343 }
0x195f   :  { %v3348_v21 = vsub.f32 %v3340_v7, %v3344_v20 }
0x1961   :  { %v3350_v12 = vmul.f32 1.442695, %v3348_v21 }
0x1962   :  { %v3347_v23 = vpop.xlane.xlu1 %3346 }
0x1963   :  { %5109 = vpow2.f32 %v3350_v12  ;;  %v3349_v24 = vsub.f32 %v3341_v11, %v3347_v23 }
0x1965   :  { %v3352_v26 = vmul.f32 1.442695, %v3349_v24 }
0x1967   :  { %5111 = vpow2.f32 %v3352_v26 }
0x196d   :  { %v5110_v27 = vpop.eup %5109 }
0x196e   :  { %v3354_v29 = vsel %vm307_vm4, %v5110_v27, 0.0 }
0x196f   :  { %3355 = vadd.xlane.f32.xlu1 %v3354_v29 }
0x1971   :  { %v5112_v30 = vpop.eup %5111 }
0x1972   :  { %v3357_v15 = vsel %vm307_vm4, %v5112_v30, 0.0 }
0x1973   :  { %3358 = vadd.xlane.f32.xlu1 %v3357_v15 }
0x1984   :  { %3364 = vrot.lane.b32.xlu1 %v5598_v61, %s5166_s0 }
0x1988   :  { %3677 = vrot.lane.b32.xlu1 %v5596_v59, %s5889_s7 }
0x199c   :  { %v2942_v25 = vpop.f32.mrb[20].mxu1 }
0x199d   :  { %v4841_v31 = vpop.f32.mrb[21].mxu1  ;;  %4849 = vmatprep.mubr.msk.f32.mxu1 %vm307_vm4, %v2942_v25 }
0x199e   :  { %4850 = vmatmul.mubr.msk.f32.vlgmr.msra.gmra.mrb[22].mxu1 %vm307_vm4, %v3018_v53 }
0x199f   :  { %4854 = vmatprep.mubr.msk.f32.mxu1 %vm307_vm4, %v5661_v36  ;;  %4853 = vmatpush3.msra.mxu1 %v4446_v19  ;;  %v4483_v19 = vld [vmem:[%s5864_s9 + $0x1] ss:$0 sm:$0xff] }
0x19a0   :  { %4867 = vmatprep.subr.mxu1 %v5157_v48 }
0x19a6   :  { %4855 = vmatmul.mubr.msk.f32.vlgmr.msra.gmra.mrb[22].mxu1 %vm307_vm4, %v5652_v16 }
0x19a7   :  { %4869 = vmatprep.mubr.msk.f32.mxu1 %vm5158_vm3, %v5157_v48 }
0x19fc   :  { %v3356_v28 = vpop.xlane.xlu1 %3355 }
0x19fd   :  { %5113 = vrcp.f32 %v3356_v28 }
0x1a00   :  { %v3359_v32 = vpop.xlane.xlu1 %3358 }
0x1a01   :  { %5115 = vrcp.f32 %v3359_v32 }
0x1a04   :  { %v3365_v34 = vpop.permute.xlu1 %3364 }
0x1a05   :  { %4868 = vmatpush3.msra.mxu1 %v3365_v34  ;;  %v4488_v34 = vld [vmem:[%s5867_s12 + $0x20] sm:$0xff] }
0x1a06   :  { %4877 = vmatprep.subr.mxu1 %v4448_v33 }
0x1a07   :  { %v5114_v36 = vpop.eup %5113 }
0x1a08   :  { %v3362_v37 = vmul.f32 %v5114_v36, %v5110_v27  ;;  %v3678_v45 = vpop.permute.xlu1 %3677 }
0x1a0a   :  { %4870 = vmatmul.mubr.msk.f32.vlgmr.msra.gmra.mrb[24].mxu1 %vm307_vm4, %v3362_v37  ;;  %v4490_v37 = vld [vmem:[%s5867_s12 + $0x30] sm:$0xff] }
0x1a0b   :  { %v5116_v16 = vpop.eup %5115  ;;  %4878 = vmatpush3.msra.mxu1 %v4448_v33 }
0x1a0c   :  { %v3363_v39 = vmul.f32 %v5116_v16, %v5112_v30  ;;  %4887 = vmatprep.subr.mxu1 %v5157_v48  ;;  %v4491_v16 = vld [vmem:[%s5867_s12 + $0x38] sm:$0xff] }
0x1a0e   :  { %4875 = vmatmul.mubr.msk.f32.vlgmr.msra.gmra.mrb[42].mxu0 %vm307_vm4, %v3363_v39 }
0x1a0f   :  { %4883 = vmatpush3.xpose.msk.msra.mxu0 %vm307_vm4, %v3602_v35  ;;  %4884 = vmatprep.mubr.msk.f32.mxu0 %vm5158_vm3, %v5157_v48  ;;  %v4489_v35 = vld [vmem:[%s5867_s12 + $0x28] sm:$0xff] }
0x1a10   :  { %4892 = vmatprep.subr.mxu0 %v5157_v48  ;;  %v4988_v36 = vpack.c.bf16 %v4489_v35, %v4488_v34 }
0x1a12   :  { %4885 = vmatmul.mubr.msk.f32.vlgmr.msra.gmra.mrb[44].mxu0 %vm307_vm4, %v3600_v40 }
0x1a13   :  { %4894 = vmatprep.mubr.msk.f32.mxu0 %vm5158_vm3, %v5157_v48 }
0x1add   :  { %v3436_v41 = vpop.f32.mrb[24].mxu1 }
0x1ade   :  { %v4871_v42 = vpop.f32.mrb[25].mxu1  ;;  %4879 = vmatprep.mubr.msk.f32.mxu1 %vm307_vm4, %v3436_v41 }
0x1ae1   :  { %v3512_v43 = vpop.f32.mrb[42].mxu0 }
0x1ae2   :  { %v4876_v44 = vpop.f32.mrb[43].mxu0  ;;  %4880 = vmatmul.mubr.msk.f32.vlgmr.msra.gmra.mrb[22].mxu1 %vm307_vm4, %v3512_v43 }
0x1ae3   :  { %4888 = vmatpush3.xpose.msk.msra.mxu1 %vm307_vm4, %v3680_v38  ;;  %4889 = vmatprep.mubr.msk.f32.mxu1 %vm5158_vm3, %v5157_v48  ;;  %v4992_v38 = vpack.c.bf16 %v4491_v16, %v4490_v37  ;;  %v4508_v16 = vld [vmem:[%s5872_s17] ss:$0 sm:$0xff] }
0x1ae4   :  { %4897 = vmatprep.subr.mxu1 %v5157_v48 }
0x1ae5   :  { %v3673_v46 = vpop.f32.mrb[44].mxu0 }
0x1ae6   :  { %v3755_v47 = vmul.f32 0.35355338, %v3673_v46  ;;  %v4886_v49 = vpop.f32.mrb[45].mxu0  ;;  %4890 = vmatmul.mubr.msk.f32.vlgmr.msra.gmra.mrb[26].mxu1 %vm307_vm4, %v3678_v45  ;;  %v4486_v46 = vld [vmem:[%s5865_s10 + $0x1] ss:$0 sm:$0xff] }
0x1ae7   :  { %4899 = vmatprep.mubr.msk.f32.mxu1 %vm5158_vm3, %v5157_v48 }
0x1ae8   :  { %v3757_v50 = vsel %vm307_vm4, %v3755_v47, -inf }
0x1ae9   :  { %3758 = vmax.xlane.f32.xlu0 %v3757_v50 }
0x1b76   :  { %v3759_v52 = vpop.xlane.xlu0 %3758 }
0x1b77   :  { %v3763_v54 = vsub.f32 %v3755_v47, %v3759_v52  ;;  %v4487_v52 = vld [vmem:[%s5866_s11 + $0x1] ss:$0 sm:$0xff] }
0x1b79   :  { %v3765_v55 = vmul.f32 1.442695, %v3763_v54 }
0x1b7b   :  { %5117 = vpow2.f32 %v3765_v55 }
0x1b85   :  { %v5118_v56 = vpop.eup %5117 }
0x1b86   :  { %v3769_v57 = vsel %vm307_vm4, %v5118_v56, 0.0 }
0x1b87   :  { %3770 = vadd.xlane.f32.xlu0 %v3769_v57 }
0x1bb9   :  { %v3751_v58 = vpop.f32.mrb[26].mxu1 }
0x1bba   :  { %v3756_v60 = vmul.f32 0.35355338, %v3751_v58  ;;  %v4891_v62 = vpop.f32.mrb[27].mxu1  ;;  %v4496_v58 = vld [vmem:[%s5869_s14 + $0x40] sm:$0xff] }
0x1bbc   :  { %v3760_v63 = vsel %vm307_vm4, %v3756_v60, -inf }
0x1bbd   :  { %3761 = vmax.xlane.f32.xlu1 %v3760_v63  ;;  %v4498_v63 = vld [vmem:[%s5869_s14 + $0x50] sm:$0xff] }
0x1bce   :  { %3855 = vrot.lane.b32.xlu1 %v5596_v59, %s5890_s30 }
0x1c14   :  { %v3771_v53 = vpop.xlane.xlu0 %3770 }
0x1c4a   :  { %v3762_v0 = vpop.xlane.xlu1 %3761 }
0x1c4b   :  { %v3764_v1 = vsub.f32 %v3756_v60, %v3762_v0  ;;  %v4497_v60 = vld [vmem:[%s5869_s14 + $0x48] sm:$0xff]  ;;  %v4499_v0 = vld [vmem:[%s5869_s14 + $0x58] sm:$0xff] }
0x1c4c   :  { %v4996_v62 = vpack.c.bf16 %v4497_v60, %v4496_v58 }
0x1c4d   :  { %v3767_v51 = vmul.f32 1.442695, %v3764_v1  ;;  %v4500_v1 = vld [vmem:[%s5869_s14 + $0x60] sm:$0xff] }
0x1c4e   :  { %v3856_v2 = vpop.permute.xlu1 %3855 }
0x1c4f   :  { %5119 = vpow2.f32 %v3767_v51  ;;  %4898 = vmatpush3.msra.mxu1 %v3856_v2  ;;  %v4501_v51 = vld [vmem:[%s5869_s14 + $0x68] sm:$0xff] }
0x1c50   :  { %5121 = vrcp.f32 %v3771_v53  ;;  %4902 = vmatprep.subr.mxu1 %v4449_v10  ;;  %v5004_v2 = vpack.c.bf16 %v4501_v51, %v4500_v1 }
0x1c59   :  { %v5120_v3 = vpop.eup %5119 }
0x1c5a   :  { %v3772_v4 = vsel %vm307_vm4, %v5120_v3, 0.0  ;;  %v5122_v6 = vpop.eup %5121 }
0x1c5b   :  { %3773 = vadd.xlane.f32.xlu0 %v3772_v4  ;;  %v3777_v7 = vmul.f32 %v5122_v6, %v5118_v56  ;;  %v4503_v4 = vld [vmem:[%s5869_s14 + $0x78] sm:$0xff] }
0x1c71   :  { %3779 = vrot.lane.b32.xlu0 %v5598_v61, %s5890_s30 }
0x1ce8   :  { %v3774_v5 = vpop.xlane.xlu0 %3773 }
0x1ce9   :  { %5123 = vrcp.f32 %v3774_v5  ;;  %v4493_v5 = vld [vmem:[%s5868_s13 + $0x1] ss:$0 sm:$0xff] }
0x1cec   :  { %v3780_v59 = vpop.permute.xlu0 %3779 }
0x1ced   :  { %4893 = vmatpush3.msra.mxu0 %v3780_v59 }
0x1cee   :  { %4895 = vmatmul.mubr.msk.f32.vlgmr.msra.gmra.mrb[46].mxu0 %vm307_vm4, %v3777_v7  ;;  %4989 = vmatprep.subr.bf16.mxu0 %v4988_v36 }
0x1cef   :  { %4991 = vmatpush3.bf16.msra.mxu0 %v4988_v36 }
0x1cf0   :  { %4993 = vmatprep.subr.bf16.mxu0 %v4992_v38 }
0x1cf3   :  { %v5124_v8 = vpop.eup %5123  ;;  %4995 = vmatpush3.bf16.msra.mxu0 %v4992_v38 }
0x1cf4   :  { %v3778_v9 = vmul.f32 %v5124_v8, %v5120_v3  ;;  %v4502_v3 = vld [vmem:[%s5869_s14 + $0x70] sm:$0xff] }
0x1cf5   :  { %v5008_v53 = vpack.c.bf16 %v4503_v4, %v4502_v3 }
0x1cf6   :  { %4900 = vmatmul.mubr.msk.f32.vlgmr.msra.gmra.mrb[28].mxu1 %vm307_vm4, %v3778_v9 }
0x1cf7   :  { %4903 = vmatpush3.msra.mxu1 %v4449_v10 }
0x1cf8   :  { %4997 = vmatprep.subr.bf16.mxu1 %v4996_v62 }
0x1dc1   :  { %v3851_v61 = vpop.f32.mrb[46].mxu0 }
0x1dc2   :  { %v4896_v11 = vpop.f32.mrb[47].mxu0  ;;  %4904 = vmatprep.mubr.msk.f32.mxu1 %vm307_vm4, %v3851_v61 }
0x1dc9   :  { %v3927_v14 = vpop.f32.mrb[28].mxu1 }
0x1dca   :  { %v4901_v17 = vpop.f32.mrb[29].mxu1  ;;  %4905 = vmatmul.mubr.msk.f32.vlgmr.msra.gmra.mrb[22].mxu1 %vm307_vm4, %v3927_v14 }
0x1dcb   :  { %4999 = vmatpush3.bf16.msra.mxu1 %v4996_v62 }
0x1e9d   :  { %v4906_v18 = vpop.f32.mrb[22].mxu1 }
0x1e9e   :  { %v4015_v20 = vadd.f32 %v4906_v18, %v5557_v22  ;;  %v4003_v21 = vpop.f32.mrb[23].mxu1 }
0x1e9f   :  { %v4014_v12 = vadd.f32 %v4003_v21, %v5560_v13 }
0x1ea0   :  { %v5759_v23 = vadd.f32 %v4483_v19, %v4015_v20 }
0x1ea1   :  { %v5761_v24 = vadd.f32 %v4483_v19, %v4014_v12  ;;  %v4284_v12 = vld [vmem:[%s5871_s16] sm:$0xff] }
0x1ea2   :  { %v4033_v26 = vsel %vm164_vm2, %v5759_v23, 0.0 }
0x1ea3   :  { %4034 = vadd.xlane.f32.xlu0 %v4033_v26  ;;  %v4030_v27 = vsel %vm164_vm2, %v5761_v24, 0.0  ;;  %v4285_v26 = vld [vmem:[%s5871_s16 + $0x8] sm:$0xff] }
0x1ea4   :  { %4031 = vadd.xlane.f32.xlu1 %v4030_v27  ;;  %v5013_v27 = vpack.c.bf16 %v4285_v26, %v4284_v12 }
0x1f30   :  { %v4035_v29 = vpop.xlane.xlu0 %4034 }
0x1f31   :  { %v4037_v30 = vmul.f32 0.03125, %v4035_v29  ;;  %v4032_v15 = vpop.xlane.xlu1 %4031  ;;  %v5170_v29 = vmov 0.0|0.0  }
0x1f32   :  { %v4036_v25 = vmul.f32 0.03125, %v4032_v15  ;;  %5012 = vmatprep.subr.bf16.mxu0 %v5170_v29  ;;  %v4287_v15 = vld [vmem:[%s5871_s16 + $0x18] sm:$0xff] }
0x1f33   :  { %v4039_v22 = vsub.f32 %v5759_v23, %v4037_v30  ;;  %v4286_v30 = vld [vmem:[%s5871_s16 + $0x10] sm:$0xff] }
0x1f34   :  { %v4038_v13 = vsub.f32 %v5761_v24, %v4036_v25  ;;  %v5016_v25 = vpack.c.bf16 %v4287_v15, %v4286_v30 }
0x1f35   :  { %v4041_v31 = vmul.f32 %v4039_v22, %v4039_v22 }
0x1f36   :  { %v4040_v28 = vmul.f32 %v4038_v13, %v4038_v13 }
0x1f37   :  { %v4045_v32 = vsel %vm164_vm2, %v4041_v31, 0.0 }
0x1f38   :  { %4046 = vadd.xlane.f32.xlu1 %v4045_v32  ;;  %v4042_v33 = vsel %vm164_vm2, %v4040_v28, 0.0 }
0x1f39   :  { %4043 = vadd.xlane.f32.xlu0 %v4042_v33 }
0x1fc5   :  { %v4047_v39 = vpop.xlane.xlu1 %4046 }
0x1fc6   :  { %v4049_v40 = vmul.f32 0.03125, %v4047_v39  ;;  %v4044_v41 = vpop.xlane.xlu0 %4043 }
0x1fc7   :  { %v4048_v42 = vmul.f32 0.03125, %v4044_v41 }
0x1fc8   :  { %v4051_v43 = vadd.f32 1e-05, %v4049_v40 }
0x1fc9   :  { %v4050_v44 = vadd.f32 1e-05, %v4048_v42 }
0x1fca   :  { %5125 = vrsqrt.f32 %v4051_v43 }
0x1fcb   :  { %5127 = vrsqrt.f32 %v4050_v44 }
0x1fd4   :  { %v5126_v45 = vpop.eup %5125 }
0x1fd5   :  { %v5128_v47 = vpop.eup %5127  ;;  %v4055_v49 = vmul.f32 %v5126_v45, %v4039_v22  ;;  %v4505_v22 = vld [vmem:[%s5870_s15 + $0x1] ss:$0 sm:$0xff]  ;;  %s4376_s15 = sshll.u32 %s5171_s26, 4  ;;  %s4377_s15 = int_to_ptr.vmem [resolvable:$true] %s4376_s15 }
0x1fd6   :  { %v4054_v50 = vmul.f32 %v5128_v47, %v4038_v13  ;;  %s5133_s3 = scalar_lea.vmem %s4377_s15, 32  ;;  %p5138_p1 = scmp.lt.s32.totalorder %s4377_s15, %s4377_s15 }
0x1fd7   :  { %v4063_v54 = vmul.f32 %v4486_v46, %v4055_v49  ;;  %p5134_p0 = scmp.ne.s32.totalorder %s4377_s15, %s5133_s3  ;;  %p5139_p2 = scmp.lt.s32.totalorder %s5133_s3, %s5133_s3 }
0x1fd8   :  { %v4062_v55 = vmul.f32 %v4486_v46, %v4054_v50 }
0x1fd9   :  { %v4071_v57 = vadd.f32 %v4487_v52, %v4063_v54  ;;  %p5140_p3 = por %p5139_p2, %p5138_p1 }
0x1fda   :  { %v4070_v56 = vadd.f32 %v4487_v52, %v4062_v55 }
0x1fdb   :  { %p5141_p4 = pnand %p5140_p3, %p5134_p0 }
0x1fdc   :  { %4915 = vmatprep.mubr.msk.f32.mxu0 %vm164_vm2, %v4070_v56 }
0x1fdd   :  { %4916 = vmatmul.mubr.msk.f32.vlgmr.msra.gmra.mrb[48].mxu0 %vm164_vm2, %v4071_v57 }
0x1fde   :  { %4945 = vmatprep.mubr.msk.f32.mxu0 %vm5158_vm3, %v5157_v48  ;;  %v5000_v48 = vpack.c.bf16 %v4499_v0, %v4498_v63  ;;  %5014 = vmatpush3.bf16.msra.mxu0 %v5013_v27 }
0x1fdf   :  { %5015 = vmatprep.subr.bf16.mxu0 %v5170_v29 }
0x1fe0   :  { %5001 = vmatprep.subr.bf16.mxu1 %v5000_v48 }
0x1fe1   :  { %5003 = vmatpush3.bf16.msra.mxu1 %v5000_v48 }
0x1fe2   :  { %5005 = vmatprep.subr.bf16.mxu1 %v5004_v2  ;;  %5017 = vmatpush3.bf16.msra.mxu0 %v5016_v25 }
0x1fe5   :  { %5007 = vmatpush3.bf16.msra.mxu1 %v5004_v2 }
0x1fe6   :  { %5009 = vmatprep.subr.bf16.mxu1 %v5008_v53 }
0x1fe9   :  { %5011 = vmatpush3.bf16.msra.mxu1 %v5008_v53 }
0x20b0   :  { %v4917_v6 = vpop.f32.mrb[48].mxu0 }
0x20b1   :  { %v4163_v7 = vadd.f32 %v4917_v6, %v4493_v5  ;;  %v4157_v59 = vpop.f32.mrb[49].mxu0 }
0x20b2   :  { %v4158_v8 = vadd.f32 %v4493_v5, %v4157_v59 }
0x20b3   :  { %v4169_v9 = vmul.f32 0.70710677, %v4163_v7  ;;  %v4167_v19 = vmul.f32 0.5, %v4163_v7 }
0x20b4   :  { %v4168_v10 = vmul.f32 0.70710677, %v4158_v8  ;;  %v4166_v17 = vmul.f32 0.5, %v4158_v8 }
0x20b5   :  { %5129 = verf.f32 %v4169_v9 }
0x20b6   :  { %5131 = verf.f32 %v4168_v10 }
0x20bf   :  { %v5130_v61 = vpop.eup %5129 }
0x20c0   :  { %v5132_v11 = vpop.eup %5131  ;;  %v4173_v14 = vadd.f32 1.0, %v5130_v61 }
0x20c1   :  { %v4172_v18 = vadd.f32 1.0, %v5132_v11 }
0x20c2   :  { %v4175_v21 = vmul.f32 %v4173_v14, %v4167_v19 }
0x20c3   :  { %v4174_v20 = vmul.f32 %v4172_v18, %v4166_v17 }
0x20c5   :  { %4934 = vmatprep.mubr.msk.f32.mxu1 %vm2131_vm5, %v4174_v20 }
0x20c6   :  { %4935 = vmatmul.mubr.msk.f32.vlgmr.msra.gmra.mrb[30].mxu1 %vm2131_vm5, %v4175_v21 }
0x2199   :  { %v4936_v13 = vpop.f32.mrb[30].mxu1 }
0x219a   :  { %v4271_v31 = vadd.f32 %v4936_v13, %v4505_v22  ;;  %v4265_v28 = vpop.f32.mrb[31].mxu1 }
0x219b   :  { %v4266_v32 = vadd.f32 %v4505_v22, %v4265_v28 }
0x219c   :  { %v4275_v33 = vadd.f32 %v4271_v31, %v5759_v23 }
0x219d   :  { %v4274_v34 = vadd.f32 %v4266_v32, %v5761_v24 }
0x219e   :  { %v4280_v35 = vrot.slane %v4275_v33, 6 }
0x219f   :  { %v4277_v36 = vrot.slane %v4274_v34, 7 }
0x21a1   :  { %v4283_v37 = vsel %vm4282_vm6, %v4277_v36, %v4280_v35 }
0x21a2   :  { %4946 = vmatmul.mubr.msk.f32.vlgmr.msra.gmra.mrb[50].mxu0 %vm164_vm2, %v4283_v37 }
0x2275   :  { %v4364_v38 = vpop.f32.mrb[50].mxu0 }
0x2276   :  { %v4365_v39 = vadd.f32 %v4508_v16, %v4364_v38  ;;  %v4947_v40 = vpop.f32.mrb[51].mxu0 }
0x2278   :  { %4369 = vst.msk [vmem:[#allocation2] sm:$0x3] %vm4368_vm7, %v4365_v39 }
0x2279   :  { %5144 = shalt.err (!%p5141_p4)
}
0x227a   :  { %s5145_s28 = scalar_lea.hbm %s5873_s18, 32 }
0x227b   :  { %p5146_p5 = scmp.ne.s32.totalorder %s5873_s18, %s5145_s28  ;;  %p5149_p6 = scmp.lt.u32.totalorder %s5145_s28, %s5873_s18 }
0x227d   :  { %p5151_p7 = pnand %p5149_p6, %p5146_p5 }
0x227f   :  { %5154 = shalt.err (!%p5151_p7)
}
0x2280   :  { %4379 = dma.vmem_to_hbm [thread:$0]  %s4377_s15, 32, %s5873_s18, [#allocation3]  }
0x2281   :  { %5155 = dma.done.wait [#allocation3], 32  }
0x2282   :  { %5156 = vsyncadd [#allocation3], 4294967264 }
0x2283   :  { %4383 = vsyncpa [#allocation3], 1 }

</bundles_post_ra>
